<compile_context>
chip_gen: v5e
topology: v5e:2x2
jax: 0.10.0
libtpu: 0.0.40
codegen_flags: <defaults>
</compile_context>

<pallas_src>
import jax
import jax.numpy as jnp
from jax.experimental import pallas as pl
from jax.experimental.pallas import tpu as pltpu

# Constants implied by the module (gym-anm ANM6Easy environment).
NB_STATE_VAR = 18        # env.state_N
NB_ACTION_VAR = 6        # env.action_space.shape[0]
NB_DISCRETE_STEPS = 500
HIDDEN = 512

S, H, A, D = NB_STATE_VAR, HIDDEN, NB_ACTION_VAR, NB_DISCRETE_STEPS
D_PAD = 512              # lane-dense padding of the discrete-step axis
TA = 2                   # actions per grid step  -> grid = (A // TA,) = (3,)
NEG_INF = -1e30          # padded-column bias so softmax ignores padding


def rf_discrete_kernel(x_ref, w1_ref, b1_ref, w2_ref, b2_ref, out_ref):
    # ---- hidden layer, recomputed per grid step (tiny: 18x512 MACs) -----
    h = jnp.dot(x_ref[...], w1_ref[...],
                preferred_element_type=jnp.float32)          # (1, H)
    h = jnp.maximum(h + b1_ref[...], 0.0)                    # (1, H)

    # ---- per-action 2-D matmul + stable softmax (static unroll over TA) --
    for a in range(TA):
        logits = jnp.dot(h, w2_ref[a],
                         preferred_element_type=jnp.float32)  # (1, D_PAD)
        logits = logits + b2_ref[a]                           # (1, D_PAD)
        m = jnp.max(logits, axis=-1, keepdims=True)           # (1, 1)
        e = jnp.exp(logits - m)                               # (1, D_PAD)
        denom = jnp.sum(e, axis=-1, keepdims=True)            # (1, 1)
        out_ref[a] = e * pl.reciprocal(denom, approx=False)   # exact -> 1e-5 tol


def prepare_params(w1_t, b1, w2_pt, b2):
    """One-time parameter layout. Call once at load time, NOT per forward.

    w1_t : (S, H)    = lin1.weight.T
    b1   : (H,)
    w2_pt: (A*D, H)  = lin2.weight (PyTorch layout)
    b2   : (A*D,)
    """
    w1_k = w1_t.astype(jnp.float32)                                   # (S, H)
    b1_k = b1.reshape(1, H).astype(jnp.float32)                       # (1, H)
    # kernel wants w2[a, k, d] = W2[a*D + d, k]
    w2_k = jnp.transpose(w2_pt.reshape(A, D, H), (0, 2, 1)).astype(jnp.float32)
    w2_k = jnp.pad(w2_k, ((0, 0), (0, 0), (0, D_PAD - D)))            # (A, H, D_PAD)
    b2_k = b2.reshape(A, 1, D).astype(jnp.float32)
    b2_k = jnp.pad(b2_k, ((0, 0), (0, 0), (0, D_PAD - D)),
                   constant_values=NEG_INF)                            # (A, 1, D_PAD)
    return w1_k, b1_k, w2_k, b2_k


@jax.jit
def rf_discrete_forward(x_vec, w1_k, b1_k, w2_k, b2_k):
    """x_vec: (S,) state vector; remaining args from prepare_params()."""
    x2 = x_vec.reshape(1, S).astype(jnp.float32)

    out_p = pl.pallas_call(
        rf_discrete_kernel,
        out_shape=jax.ShapeDtypeStruct((A, 1, D_PAD), jnp.float32),
        grid=(A // TA,),
        in_specs=[
            pl.BlockSpec((1, S), lambda a: (0, 0)),            # x       (resident)
            pl.BlockSpec((S, H), lambda a: (0, 0)),            # w1      (resident)
            pl.BlockSpec((1, H), lambda a: (0, 0)),            # b1      (resident)
            pl.BlockSpec((TA, H, D_PAD), lambda a: (a, 0, 0)),  # w2 tile (pipelined)
            pl.BlockSpec((TA, 1, D_PAD), lambda a: (a, 0, 0)),  # b2 tile
        ],
        out_specs=pl.BlockSpec((TA, 1, D_PAD), lambda a: (a, 0, 0)),
        compiler_params=pltpu.CompilerParams(
            dimension_semantics=("parallel",),   # independent steps -> v7x 2-TC split
            vmem_limit_bytes=16 << 20,           # ~4 MB working set + headroom
        ),
    )(x2, w1_k, b1_k, w2_k, b2_k)

    return out_p[:, 0, :D]                                     # (A, D)


def reference_forward(x_vec, w1_t, b1, w2_pt, b2):
    h = jnp.maximum(x_vec @ w1_t + b1, 0.0)
    logits = h @ w2_pt.T + b2
    logits = logits.reshape(A, D)
    return jax.nn.softmax(logits, axis=-1)


if __name__ == "__main__":
    key = jax.random.PRNGKey(0)
    k_x, k_w1, k_b1, k_w2, k_b2 = jax.random.split(key, 5)

    # Deterministic synthetic parameters (PyTorch-style uniform fan-in init).
    bound1 = 1.0 / jnp.sqrt(S)
    bound2 = 1.0 / jnp.sqrt(H)
    w1_t = jax.random.uniform(k_w1, (S, H), jnp.float32, -bound1, bound1)       # lin1.weight.T
    b1 = jax.random.uniform(k_b1, (H,), jnp.float32, -bound1, bound1)
    w2_pt = jax.random.uniform(k_w2, (A * D, H), jnp.float32, -bound2, bound2)  # lin2.weight
    b2 = jax.random.uniform(k_b2, (A * D,), jnp.float32, -bound2, bound2)

    x = jax.random.normal(k_x, (S,), jnp.float32)  # single state vector

    # One-time weight layout (outside the per-call hot path).
    params = prepare_params(w1_t, b1, w2_pt, b2)
    params = jax.block_until_ready(params)

    out = rf_discrete_forward(x, *params)
    out = jax.block_until_ready(out)

    ref = reference_forward(x, w1_t, b1, w2_pt, b2)
    assert out.shape == (A, D)
    assert jnp.allclose(out, ref, atol=1e-5, rtol=1e-5)
    assert jnp.allclose(jnp.sum(out, axis=-1), jnp.ones((A,)), atol=1e-5)

    print("KERNEL_OK")
</pallas_src>

<mosaic_0001>
module attributes {stable_mosaic.version = 11 : i64} {
  func.func @rf_discrete_kernel(%arg0: i32, %arg1: memref<1x18xf32, #tpu.memory_space<vmem>>, %arg2: memref<18x512xf32, #tpu.memory_space<vmem>>, %arg3: memref<1x512xf32, #tpu.memory_space<vmem>>, %arg4: memref<2x512x512xf32, #tpu.memory_space<vmem>>, %arg5: memref<2x1x512xf32, #tpu.memory_space<vmem>>, %arg6: memref<2x1x512xf32, #tpu.memory_space<vmem>>) attributes {dimension_semantics = [#tpu.dimension_semantics<parallel>], iteration_bounds = array<i64: 3>, scalar_prefetch = 0 : i64, scratch_operands = 0 : i64, tpu.core_type = #tpu.core_type<tc>, window_params = [{pipeline_mode = #tpu.pipeline_mode<synchronous>, transform_indices = @transform_0, window_bounds = array<i64: 1, 18>}, {pipeline_mode = #tpu.pipeline_mode<synchronous>, transform_indices = @transform_1, window_bounds = array<i64: 18, 512>}, {pipeline_mode = #tpu.pipeline_mode<synchronous>, transform_indices = @transform_2, window_bounds = array<i64: 1, 512>}, {transform_indices = @transform_3, window_bounds = array<i64: 2, 512, 512>}, {transform_indices = @transform_4, window_bounds = array<i64: 2, 1, 512>}, {transform_indices = @transform_5, window_bounds = array<i64: 2, 1, 512>}]} {
    %c0 = arith.constant 0 : index
    %c0_0 = arith.constant 0 : index
    %0 = vector.load %arg1[%c0, %c0_0] : memref<1x18xf32, #tpu.memory_space<vmem>>, vector<1x18xf32>
    %c0_1 = arith.constant 0 : index
    %c0_2 = arith.constant 0 : index
    %1 = vector.load %arg2[%c0_1, %c0_2] : memref<18x512xf32, #tpu.memory_space<vmem>>, vector<18x512xf32>
    %cst = arith.constant dense<0.000000e+00> : vector<1x512xf32>
    %2 = tpu.matmul %0, %1, %cst {dimension_numbers = #tpu.dot_dimension_numbers<[1], [0], [0], [1], [0, 0, 1, 1], [], []>} : vector<1x18xf32>, vector<18x512xf32>, vector<1x512xf32> -> vector<1x512xf32>
    %c0_3 = arith.constant 0 : index
    %c0_4 = arith.constant 0 : index
    %3 = vector.load %arg3[%c0_3, %c0_4] : memref<1x512xf32, #tpu.memory_space<vmem>>, vector<1x512xf32>
    %4 = arith.addf %2, %3 : vector<1x512xf32>
    %cst_5 = arith.constant 0.000000e+00 : f32
    %5 = vector.broadcast %cst_5 : f32 to vector<1x512xf32>
    %6 = arith.maximumf %4, %5 : vector<1x512xf32>
    %c0_6 = arith.constant 0 : index
    %c0_7 = arith.constant 0 : index
    %c0_8 = arith.constant 0 : index
    %7 = vector.load %arg4[%c0_6, %c0_7, %c0_8] : memref<2x512x512xf32, #tpu.memory_space<vmem>>, vector<1x512x512xf32>
    %8 = vector.shape_cast %7 : vector<1x512x512xf32> to vector<512x512xf32>
    %cst_9 = arith.constant dense<0.000000e+00> : vector<1x512xf32>
    %9 = tpu.matmul %6, %8, %cst_9 {dimension_numbers = #tpu.dot_dimension_numbers<[1], [0], [0], [1], [0, 0, 1, 1], [], []>} : vector<1x512xf32>, vector<512x512xf32>, vector<1x512xf32> -> vector<1x512xf32>
    %c0_10 = arith.constant 0 : index
    %c0_11 = arith.constant 0 : index
    %c0_12 = arith.constant 0 : index
    %10 = vector.load %arg5[%c0_10, %c0_11, %c0_12] : memref<2x1x512xf32, #tpu.memory_space<vmem>>, vector<1x1x512xf32>
    %11 = vector.shape_cast %10 : vector<1x1x512xf32> to vector<1x512xf32>
    %12 = arith.addf %9, %11 : vector<1x512xf32>
    %cst_13 = arith.constant dense<0xFF800000> : vector<1xf32>
    %13 = vector.multi_reduction <maximumf>, %12, %cst_13 [1] : vector<1x512xf32> to vector<1xf32>
    %14 = vector.shape_cast %13 : vector<1xf32> to vector<1x1xf32>
    %15 = vector.broadcast %14 : vector<1x1xf32> to vector<1x512xf32>
    %16 = arith.subf %12, %15 : vector<1x512xf32>
    %17 = math.exp %16 : vector<1x512xf32>
    %cst_14 = arith.constant dense<0.000000e+00> : vector<1xf32>
    %18 = vector.multi_reduction <add>, %17, %cst_14 [1] : vector<1x512xf32> to vector<1xf32>
    %19 = vector.shape_cast %18 : vector<1xf32> to vector<1x1xf32>
    %20 = tpu.reciprocal %19 : vector<1x1xf32> -> vector<1x1xf32>
    %21 = vector.broadcast %20 : vector<1x1xf32> to vector<1x512xf32>
    %22 = arith.mulf %17, %21 : vector<1x512xf32>
    %c0_15 = arith.constant 0 : index
    %c0_16 = arith.constant 0 : index
    %c0_17 = arith.constant 0 : index
    %23 = vector.load %arg6[%c0_15, %c0_16, %c0_17] : memref<2x1x512xf32, #tpu.memory_space<vmem>>, vector<1x1x512xf32>
    %24 = vector.shape_cast %23 : vector<1x1x512xf32> to vector<1x512xf32>
    %25 = vector.shape_cast %22 : vector<1x512xf32> to vector<1x1x512xf32>
    tpu.vector_store %arg6[%c0_15, %c0_16, %c0_17], %25 {strides = array<i32>} : memref<2x1x512xf32, #tpu.memory_space<vmem>>, vector<1x1x512xf32>,
    %c1 = arith.constant 1 : index
    %c0_18 = arith.constant 0 : index
    %c0_19 = arith.constant 0 : index
    %26 = vector.load %arg4[%c1, %c0_18, %c0_19] : memref<2x512x512xf32, #tpu.memory_space<vmem>>, vector<1x512x512xf32>
    %27 = vector.shape_cast %26 : vector<1x512x512xf32> to vector<512x512xf32>
    %cst_20 = arith.constant dense<0.000000e+00> : vector<1x512xf32>
    %28 = tpu.matmul %6, %27, %cst_20 {dimension_numbers = #tpu.dot_dimension_numbers<[1], [0], [0], [1], [0, 0, 1, 1], [], []>} : vector<1x512xf32>, vector<512x512xf32>, vector<1x512xf32> -> vector<1x512xf32>
    %c1_21 = arith.constant 1 : index
    %c0_22 = arith.constant 0 : index
    %c0_23 = arith.constant 0 : index
    %29 = vector.load %arg5[%c1_21, %c0_22, %c0_23] : memref<2x1x512xf32, #tpu.memory_space<vmem>>, vector<1x1x512xf32>
    %30 = vector.shape_cast %29 : vector<1x1x512xf32> to vector<1x512xf32>
    %31 = arith.addf %28, %30 : vector<1x512xf32>
    %cst_24 = arith.constant dense<0xFF800000> : vector<1xf32>
    %32 = vector.multi_reduction <maximumf>, %31, %cst_24 [1] : vector<1x512xf32> to vector<1xf32>
    %33 = vector.shape_cast %32 : vector<1xf32> to vector<1x1xf32>
    %34 = vector.broadcast %33 : vector<1x1xf32> to vector<1x512xf32>
    %35 = arith.subf %31, %34 : vector<1x512xf32>
    %36 = math.exp %35 : vector<1x512xf32>
    %cst_25 = arith.constant dense<0.000000e+00> : vector<1xf32>
    %37 = vector.multi_reduction <add>, %36, %cst_25 [1] : vector<1x512xf32> to vector<1xf32>
    %38 = vector.shape_cast %37 : vector<1xf32> to vector<1x1xf32>
    %39 = tpu.reciprocal %38 : vector<1x1xf32> -> vector<1x1xf32>
    %40 = vector.broadcast %39 : vector<1x1xf32> to vector<1x512xf32>
    %41 = arith.mulf %36, %40 : vector<1x512xf32>
    %c1_26 = arith.constant 1 : index
    %c0_27 = arith.constant 0 : index
    %c0_28 = arith.constant 0 : index
    %42 = vector.load %arg6[%c1_26, %c0_27, %c0_28] : memref<2x1x512xf32, #tpu.memory_space<vmem>>, vector<1x1x512xf32>
    %43 = vector.shape_cast %42 : vector<1x1x512xf32> to vector<1x512xf32>
    %44 = vector.shape_cast %41 : vector<1x512xf32> to vector<1x1x512xf32>
    tpu.vector_store %arg6[%c1_26, %c0_27, %c0_28], %44 {strides = array<i32>} : memref<2x1x512xf32, #tpu.memory_space<vmem>>, vector<1x1x512xf32>,
    return
  }
  func.func @transform_0(%arg0: i32) -> (i32, i32) {
    %c0_i32 = arith.constant 0 : i32
    %c0_i32_0 = arith.constant 0 : i32
    %c0_i32_1 = arith.constant 0 : i32
    return %c0_i32, %c0_i32_0 : i32, i32
  }
  func.func @transform_1(%arg0: i32) -> (i32, i32) {
    %c0_i32 = arith.constant 0 : i32
    %c0_i32_0 = arith.constant 0 : i32
    %c0_i32_1 = arith.constant 0 : i32
    return %c0_i32, %c0_i32_0 : i32, i32
  }
  func.func @transform_2(%arg0: i32) -> (i32, i32) {
    %c0_i32 = arith.constant 0 : i32
    %c0_i32_0 = arith.constant 0 : i32
    %c0_i32_1 = arith.constant 0 : i32
    return %c0_i32, %c0_i32_0 : i32, i32
  }
  func.func @transform_3(%arg0: i32) -> (i32, i32, i32) {
    %c0_i32 = arith.constant 0 : i32
    %c0_i32_0 = arith.constant 0 : i32
    %c0_i32_1 = arith.constant 0 : i32
    return %arg0, %c0_i32, %c0_i32_0 : i32, i32, i32
  }
  func.func @transform_4(%arg0: i32) -> (i32, i32, i32) {
    %c0_i32 = arith.constant 0 : i32
    %c0_i32_0 = arith.constant 0 : i32
    %c0_i32_1 = arith.constant 0 : i32
    return %arg0, %c0_i32, %c0_i32_0 : i32, i32, i32
  }
  func.func @transform_5(%arg0: i32) -> (i32, i32, i32) {
    %c0_i32 = arith.constant 0 : i32
    %c0_i32_0 = arith.constant 0 : i32
    %c0_i32_1 = arith.constant 0 : i32
    return %arg0, %c0_i32, %c0_i32_0 : i32, i32, i32
  }
}

</mosaic_0001>

<bundles_post_ra>
// kernel: rf_discrete_forward.1
= control target key start
LH: loop header
LB: loop body
LE: loop exit
PB: predicated region body
PF: predicated region fallthrough
CT: control target
= control target key end

     0   :  { %s3304_s0 = inlined_call_operand.hbm [shape: f32[1,18], index: 0, kind: input, shape index: {}]   ;;  %s3305_s1 = inlined_call_operand.hbm [shape: f32[18,512], index: 1, kind: input, shape index: {}]   ;;  %s3306_s2 = inlined_call_operand.hbm [shape: f32[1,512], index: 2, kind: input, shape index: {}]   ;;  %s3307_s3 = inlined_call_operand.hbm [shape: f32[6,512,512], index: 3, kind: input, shape index: {}]   ;;  %s3308_s4 = inlined_call_operand.hbm [shape: f32[6,1,512], index: 4, kind: input, shape index: {}]   ;;  %s3309_s5 = inlined_call_operand.vmem [shape: f32[6,1,512], index: 5, kind: output, shape index: {}]  }
   0x1   :  { %3312 = sst [smem:[#allocation13_spill]] %s3304_s0 }
   0x2   :  { %3313 = sst [smem:[#allocation14_spill]] %s3305_s1 }
   0x3   :  { %10 = vsyncpa [#allocation3], 0 }
   0x4   :  { %11 = vsyncpa [#allocation5], 0 }
   0x5   :  { %12 = vsyncpa [#allocation8], 0 }
   0x6   :  { %14 = vsyncpa [#allocation8 + $0x1], 0  ;;  %s2502_s18 = smov 0   ;;  %s2504_s19 = smov 0  }
   0x7   :  { %s2506_s20 = smov 0   ;;  %s2508_s21 = smov 0  }
   0x8 LB: > { %s2521_s22 = sadd.s32 4294967295, %s2463_s21   ;;  %p103_p0 = scmp.ne.s32.totalorder %s2455_s19, %s2451_s18  ;;  %s2463_s21 = sphi %s2508_s21, %s3328_s21   ;;  %s2459_s20 = sphi %s2506_s20, %s3327_s20   ;;  %s2455_s19 = sphi %s2504_s19, %s3326_s19   ;;  %s2451_s18 = sphi %s2502_s18, %s3325_s18  }
   0x9   : > { %p104_p1 = scmp.eq.s32.totalorder %s2521_s22, 0  ;;  %p1881_p2 = scmp.ge.s32.totalorder %s2463_s21, 1 }
   0xa   : > { %p166_p3 = scmp.lt.s32.totalorder %s2463_s21, 4  ;;  %s3315_s1 = sld [smem:[#allocation14_spill]] }
   0xb   : > { %p2529_p4 = por %p104_p1, %p103_p0  ;;  %s2465_s28 = smov [#allocation4]  }
   0xc   : > { %p2536_p5 = pnand %p1881_p2, %p166_p3  ;;  %s191_s29 = sshll.u32 %s2465_s28, 4  ;;  %s192_s29 = int_to_ptr.vmem [resolvable:$true] %s191_s29 }
   0xd   : > { %s2549_s6 = sadd.s32 1, %s2463_s21   ;;  %s3310_s7 = smov 512  }
   0xe   : > { %p2188_p6 = pneg %p2536_p5  ;;  %s3311_s8 = smov 32  }
   0xf   : > { %s87_s9 = ssub.s32 %s2463_s21, %s2549_s6  ;;  %s90_s10 = sadd.s32 1, %s2459_s20 }
  0x10   : > { %s189_s26 = sshll.u32 %s3315_s1, 4  ;;  %p2544_p7 = pnand %p2188_p6, %p104_p1  ;;  %s190_s26 = int_to_ptr.hbm [resolvable:$true] %s189_s26 }
  0x11   : > { %p88_p8 = scmp.eq.s32.totalorder %s87_s9, 0  ;;  %p97_p9 = scmp.ne.s32.totalorder %s2459_s20, %s2455_s19 }
  0x12   : > { %2194 = dma.hbm_to_vmem [thread:$0]  (!%p2544_p7), %s190_s26, 1536, %s192_s29, [#allocation5], %s3310_s7, %s3310_s7, %s3311_s8  }
  0x13   : > { %p98_p10 = scmp.eq.s32.totalorder %s2463_s21, 0  ;;  %p2208_p11 = scmp.lt.s32.totalorder %s2463_s21, 3 }
  0x14   : > { %s2564_s11 = scalar_select %p88_p8, %s2459_s20, %s90_s10  }
  0x15   : > { %p99_p12 = por %p98_p10, %p97_p9  ;;  %s217_s12 = sand.u32 1, %s2463_s21  }
  0x16   : > { %s219_s13 = sand.u32 1, %s2459_s20   ;;  %s2170_s15 = sshll.u32 %s2463_s21, 12 }
  0x17   : > { %s1886_s14 = sshll.u32 %s219_s13, 12  ;;  %s227_s18 = scalar_lea.hbm %s3307_s3, %s2170_s15 }
  0x18   : > { %s228_s24 = sshll.u32 %s227_s18, 4  ;;  %s221_s25 = scalar_lea.vmem [#allocation7], %s1886_s14  ;;  %s229_s24 = int_to_ptr.hbm [resolvable:$true] %s228_s24 }
  0x19   : > { %s230_s26 = sshll.u32 %s221_s25, 4  ;;  %p2574_p13 = pnand %p2208_p11, %p99_p12  ;;  %s231_s26 = int_to_ptr.vmem [resolvable:$true] %s230_s26 }
  0x1a   : > { %s1890_s29 = sshll.u32 %s219_s13, 3  ;;  %s3319_s0 = sld [smem:[#allocation13_spill]] }
  0x1b   : > { %s244_s8 = scalar_lea.vmem [#allocation9], %s1890_s29  ;;  %s2583_s15 = scalar_lea.sflag [#allocation8], %s217_s12 }
  0x1c   : > { %s2581_s16 = sshll.u32 %s244_s8, 4  ;;  %s2301_s14 = sshra.s32 %s229_s24, 4  ;;  %s2302_s14 = int_to_ptr.hbm [resolvable:$true] %s2301_s14  ;;  %s253_s16 = int_to_ptr.vmem [resolvable:$true] %s2581_s16 }
  0x1d   : > { %s2303_s17 = scalar_lea.hbm %s2302_s14, 4096  ;;  %p2305_p2 = pneg %p2574_p13 }
  0x1e   : > { %p2304_p0 = scmp.ne.s32.totalorder %s2302_s14, %s2303_s17  ;;  %s2308_s25 = scalar_lea.hbm %s3307_s3, 12288 }
  0x1f   : > { %p2309_p8 = scmp.lt.s32.totalorder %s2302_s14, %s3307_s3  ;;  %p2310_p9 = scmp.lt.s32.totalorder %s2308_s25, %s2303_s17 }
  0x20   : > { %s178_s7 = sshll.u32 %s3319_s0, 4  ;;  %p2306_p3 = pnand %p2305_p2, %p2304_p0  ;;  %s179_s7 = int_to_ptr.hbm [resolvable:$true] %s178_s7 }
  0x21   : > { %p2311_p10 = por %p2310_p9, %p2309_p8 }
  0x22   : > { %p2307_p6 = pneg %p2306_p3 }
  0x24   : > { %p2312_p11 = pnand %p2311_p10, %p2307_p6 }
  0x26   : > { %2315 = shalt.err (!%p2312_p11)
}
  0x27   : > { %s3320_s8 = smov 32   ;;  %s3321_s12 = smov 512  }
  0x28   : > { %2201 = dma.hbm_to_vmem [thread:$0]  (!%p2574_p13), %s229_s24, 65536, %s231_s26, %s2583_s15, %s3321_s12, %s3321_s12, %s3320_s8  }
  0x29   : > { %s2468_s10 = smov [#allocation2]   ;;  %s204_s17 = sshll.u32 %s3306_s2, 4  ;;  %s205_s17 = int_to_ptr.hbm [resolvable:$true] %s204_s17 }
  0x2a   : > { %s180_s13 = sshll.u32 %s2468_s10, 4  ;;  %s2171_s25 = sshll.u32 %s2463_s21, 3  ;;  %s181_s13 = int_to_ptr.vmem [resolvable:$true] %s180_s13 }
  0x2b   : > { %2191 = dma.hbm_to_vmem [thread:$0]  (!%p2544_p7), %s179_s7, 16, %s181_s13, [#allocation3]  }
  0x2c   : > { %s2469_s9 = smov [#allocation6]   ;;  %s249_s24 = scalar_lea.hbm %s3308_s4, %s2171_s25 }
  0x2d   : > { %s206_s29 = sshll.u32 %s2469_s9, 4  ;;  %s250_s26 = sshll.u32 %s249_s24, 4  ;;  %s207_s29 = int_to_ptr.vmem [resolvable:$true] %s206_s29  ;;  %s251_s26 = int_to_ptr.hbm [resolvable:$true] %s250_s26 }
  0x2e   : > { %2197 = dma.hbm_to_vmem [thread:$0]  (!%p2544_p7), %s205_s17, 64, %s207_s29, [#allocation5]  }
  0x2f   : > { %s2391_s8 = sshra.s32 %s251_s26, 4  ;;  %s2398_s10 = scalar_lea.hbm %s3308_s4, 24  ;;  %s2392_s8 = int_to_ptr.hbm [resolvable:$true] %s2391_s8 }
  0x30   : > { %s2393_s12 = scalar_lea.hbm %s2392_s8, 8  ;;  %p2399_p6 = scmp.lt.s32.totalorder %s2392_s8, %s3308_s4 }
  0x31   : > { %p2394_p12 = scmp.ne.s32.totalorder %s2392_s8, %s2393_s12  ;;  %p2400_p8 = scmp.lt.s32.totalorder %s2398_s10, %s2393_s12 }
  0x33   : > { %p2396_p0 = pnand %p2394_p12, %p2305_p2  ;;  %p2401_p7 = por %p2400_p8, %p2399_p6 }
  0x35   : > { %p2397_p3 = pneg %p2396_p0 }
  0x37   : > { %p2402_p9 = pnand %p2401_p7, %p2397_p3 }
  0x39   : > { %2405 = shalt.err (!%p2402_p9)
}
  0x3a   : > { %s2470_s30 = smov 64   ;;  %s2471_s13 = smov 4  }
  0x3b   : > { %2204 = dma.hbm_to_vmem [thread:$0]  (!%p2574_p13), %s251_s26, 128, %s253_s16, %s2583_s15, %s2470_s30, %s2470_s30, %s2471_s13  }
  0x3c   : > { %264 = sbr.rel (%p2536_p5) target bundleno = 837 (0x345), region = 40 }
  0x41   : > { %2438 = dma.done.wait (%p104_p1), [#allocation3], 16  }
  0x42   : > { %2440 = vsyncadd (%p104_p1), [#allocation3], 4294967280 }
  0x43   : > { %2442 = dma.done.wait (%p104_p1), [#allocation5], 1600  }
  0x44   : > { %2444 = vsyncadd (%p104_p1), [#allocation5], 4294965696  ;;  %s281_s28 = sand.u32 1, %s2521_s22   ;;  %s283_s16 = sand.u32 1, %s2455_s19  }
  0x45   : > { %s1897_s27 = sshll.u32 %s283_s16, 12  ;;  %s282_s15 = scalar_lea.sflag [#allocation8], %s281_s28 }
  0x46   : > { %s2640_s18 = scalar_lea.vmem [#allocation7], %s1897_s27 }
  0x47   : > { %2446 = dma.done.wait (%p2529_p4), %s282_s15, 65664  }
  0x48   : > { %2448 = vsyncadd (%p2529_p4), %s282_s15, 4294901632  ;;  %vm363_vm0 = vcmask 1041408   ;;  %v345_v0 = vld [vmem:[#allocation4 + $0x40] sm:$0x3]  ;;  %v346_v1 = vld [vmem:[#allocation4 + $0x48] sm:$0x3] }
  0x49   : > { %v347_v2 = vld [vmem:[#allocation4 + $0x50] sm:$0x3]  ;;  %1901 = vmatpush.msk.msra.mxu0 %vm363_vm0, %v345_v0  ;;  %1903 = vmatpush.msk.msra.mxu1 %vm363_vm0, %v346_v1  ;;  %v348_v3 = vld [vmem:[#allocation4 + $0x58] sm:$0x3]  ;;  %v341_v4 = vld [vmem:[#allocation4 + $0x20] sm:$0xff]  ;;  %vm359_vm1 = vcmask 146432  }
  0x4a   : > { %v342_v5 = vld [vmem:[#allocation4 + $0x28] sm:$0xff]  ;;  %1905 = vmatpush.msk.msra.mxu2 %vm363_vm0, %v347_v2  ;;  %1907 = vmatpush.msk.msra.mxu3 %vm363_vm0, %v348_v3  ;;  %v343_v6 = vld [vmem:[#allocation4 + $0x30] sm:$0xff]  ;;  %v344_v7 = vld [vmem:[#allocation4 + $0x38] sm:$0xff]  ;;  %s3162_s23 = sshll.u32 %s283_s16, 3  ;;  %vm1046_vm2 = vcmask 1040384   ;;  %s1899_s17 = sshll.u32 %s2521_s22, 1 }
  0x4b   : > { %v337_v8 = vld [vmem:[#allocation4] sm:$0xff]  ;;  %390 = vmatpush.msra.mxu0 %v341_v4  ;;  %410 = vmatpush.msra.mxu1 %v342_v5  ;;  %v338_v9 = vld [vmem:[#allocation4 + $0x8] sm:$0xff]  ;;  %v339_v10 = vld [vmem:[#allocation4 + $0x10] sm:$0xff]  ;;  %s295_s14 = scalar_lea.vmem [#allocation9], %s3162_s23  ;;  %p3257_p1 = scmp.lt.s32.totalorder %s1899_s17, 5  ;;  %vm1103_vm7 = vcmask 1042434  }
  0x4c   : > { %v340_v11 = vld [vmem:[#allocation4 + $0x18] sm:$0xff]  ;;  %430 = vmatpush.msra.mxu2 %v343_v6  ;;  %450 = vmatpush.msra.mxu3 %v344_v7  ;;  %v520_v13 = vld [vmem:[%s2640_s18 + $0x1e0] sm:$0xff] }
  0x4d   : > { %v336_v12 = vld [vmem:[#allocation2] sm:$0x1]  ;;  %391 = vmatpush.msra.mxu0 %v337_v8  ;;  %411 = vmatpush.msra.mxu1 %v338_v9  ;;  %v584_v14 = vld [vmem:[%s2640_s18 + $0x3e0] sm:$0xff]  ;;  %s3330_s17 = smov (!%p3257_p1, %s1899_s17), 5 }
  0x4e   : > { %431 = vmatpush.msra.mxu2 %v339_v10  ;;  %451 = vmatpush.msra.mxu3 %v340_v11  ;;  %v648_v15 = vld [vmem:[%s2640_s18 + $0x5e0] sm:$0xff]  ;;  %v521_v11 = vld [vmem:[%s2640_s18 + $0x1e8] sm:$0xff]  ;;  %s1900_s22 = sshll.u32 %s3330_s17, 2 }
  0x4f   : > { %1902 = vmatmul.msk.f32.vlgmr.msra.gmra.mxu0 %vm359_vm1, %v336_v12  ;;  %1904 = vmatmul.msk.f32.vlgmr.msra.gmra.mxu1 %vm359_vm1, %v336_v12  ;;  %v712_v16 = vld [vmem:[%s2640_s18 + $0x7e0] sm:$0xff]  ;;  %s3273_s24 = scalar_lea.vmem %s3309_s5, %s1900_s22 }
  0x50   : > { %1906 = vmatmul.msk.f32.vlgmr.msra.gmra.mxu2 %vm359_vm1, %v336_v12  ;;  %1908 = vmatmul.msk.f32.vlgmr.msra.gmra.mxu3 %vm359_vm1, %v336_v12  ;;  %v516_v17 = vld [vmem:[%s2640_s18 + $0x1c0] sm:$0xff]  ;;  %v585_v12 = vld [vmem:[%s2640_s18 + $0x3e8] sm:$0xff] }
  0x51   : > { %v580_v18 = vld [vmem:[%s2640_s18 + $0x3c0] sm:$0xff]  ;;  %726 = vmatpush.msrb.mxu0 %v520_v13  ;;  %746 = vmatpush.msrb.mxu1 %v584_v14 }
  0x52   : > { %v644_v19 = vld [vmem:[%s2640_s18 + $0x5c0] sm:$0xff]  ;;  %766 = vmatpush.msrb.mxu2 %v648_v15  ;;  %786 = vmatpush.msrb.mxu3 %v712_v16  ;;  %v517_v15 = vld [vmem:[%s2640_s18 + $0x1c8] sm:$0xff] }
  0x53   : > { %v708_v20 = vld [vmem:[%s2640_s18 + $0x7c0] sm:$0xff]  ;;  %727 = vmatpush.msrb.mxu0 %v516_v17  ;;  %747 = vmatpush.msrb.mxu1 %v580_v18  ;;  %v581_v16 = vld [vmem:[%s2640_s18 + $0x3c8] sm:$0xff] }
  0x54   : > { %v512_v21 = vld [vmem:[%s2640_s18 + $0x1a0] sm:$0xff]  ;;  %767 = vmatpush.msrb.mxu2 %v644_v19  ;;  %787 = vmatpush.msrb.mxu3 %v708_v20  ;;  %v649_v17 = vld [vmem:[%s2640_s18 + $0x5e8] sm:$0xff] }
  0x55   : > { %v576_v22 = vld [vmem:[%s2640_s18 + $0x3a0] sm:$0xff]  ;;  %728 = vmatpush.msrb.mxu0 %v512_v21  ;;  %v713_v18 = vld [vmem:[%s2640_s18 + $0x7e8] sm:$0xff] }
  0x56   : > { %v640_v23 = vld [vmem:[%s2640_s18 + $0x5a0] sm:$0xff]  ;;  %748 = vmatpush.msrb.mxu1 %v576_v22  ;;  %v513_v19 = vld [vmem:[%s2640_s18 + $0x1a8] sm:$0xff] }
  0x57   : > { %v704_v24 = vld [vmem:[%s2640_s18 + $0x7a0] sm:$0xff]  ;;  %768 = vmatpush.msrb.mxu2 %v640_v23  ;;  %v577_v20 = vld [vmem:[%s2640_s18 + $0x3a8] sm:$0xff] }
  0x58   : > { %v508_v25 = vld [vmem:[%s2640_s18 + $0x180] sm:$0xff]  ;;  %788 = vmatpush.msrb.mxu3 %v704_v24  ;;  %v645_v21 = vld [vmem:[%s2640_s18 + $0x5c8] sm:$0xff] }
  0x59   : > { %v572_v26 = vld [vmem:[%s2640_s18 + $0x380] sm:$0xff]  ;;  %729 = vmatpush.msrb.mxu0 %v508_v25  ;;  %v709_v22 = vld [vmem:[%s2640_s18 + $0x7c8] sm:$0xff] }
  0x5a   : > { %v636_v27 = vld [vmem:[%s2640_s18 + $0x580] sm:$0xff]  ;;  %749 = vmatpush.msrb.mxu1 %v572_v26  ;;  %v509_v23 = vld [vmem:[%s2640_s18 + $0x188] sm:$0xff] }
  0x5b   : > { %v700_v28 = vld [vmem:[%s2640_s18 + $0x780] sm:$0xff]  ;;  %769 = vmatpush.msrb.mxu2 %v636_v27  ;;  %v573_v24 = vld [vmem:[%s2640_s18 + $0x388] sm:$0xff] }
  0x5c   : > { %v504_v29 = vld [vmem:[%s2640_s18 + $0x160] sm:$0xff]  ;;  %789 = vmatpush.msrb.mxu3 %v700_v28  ;;  %v641_v25 = vld [vmem:[%s2640_s18 + $0x5a8] sm:$0xff] }
  0x5d   : > { %v568_v30 = vld [vmem:[%s2640_s18 + $0x360] sm:$0xff]  ;;  %730 = vmatpush.msrb.mxu0 %v504_v29  ;;  %v705_v26 = vld [vmem:[%s2640_s18 + $0x7a8] sm:$0xff] }
  0x5e   : > { %v632_v31 = vld [vmem:[%s2640_s18 + $0x560] sm:$0xff]  ;;  %750 = vmatpush.msrb.mxu1 %v568_v30  ;;  %v505_v27 = vld [vmem:[%s2640_s18 + $0x168] sm:$0xff] }
  0x5f   : > { %v696_v32 = vld [vmem:[%s2640_s18 + $0x760] sm:$0xff]  ;;  %770 = vmatpush.msrb.mxu2 %v632_v31  ;;  %v569_v28 = vld [vmem:[%s2640_s18 + $0x368] sm:$0xff] }
  0x60   : > { %v500_v33 = vld [vmem:[%s2640_s18 + $0x140] sm:$0xff]  ;;  %790 = vmatpush.msrb.mxu3 %v696_v32  ;;  %v637_v29 = vld [vmem:[%s2640_s18 + $0x588] sm:$0xff] }
  0x61   : > { %v564_v34 = vld [vmem:[%s2640_s18 + $0x340] sm:$0xff]  ;;  %731 = vmatpush.msrb.mxu0 %v500_v33  ;;  %v701_v30 = vld [vmem:[%s2640_s18 + $0x788] sm:$0xff] }
  0x62   : > { %v628_v35 = vld [vmem:[%s2640_s18 + $0x540] sm:$0xff]  ;;  %751 = vmatpush.msrb.mxu1 %v564_v34  ;;  %v501_v31 = vld [vmem:[%s2640_s18 + $0x148] sm:$0xff] }
  0x63   : > { %v692_v36 = vld [vmem:[%s2640_s18 + $0x740] sm:$0xff]  ;;  %771 = vmatpush.msrb.mxu2 %v628_v35  ;;  %v565_v32 = vld [vmem:[%s2640_s18 + $0x348] sm:$0xff] }
  0x64   : > { %v496_v37 = vld [vmem:[%s2640_s18 + $0x120] sm:$0xff]  ;;  %791 = vmatpush.msrb.mxu3 %v692_v36  ;;  %v633_v33 = vld [vmem:[%s2640_s18 + $0x568] sm:$0xff] }
  0x65   : > { %v560_v38 = vld [vmem:[%s2640_s18 + $0x320] sm:$0xff]  ;;  %732 = vmatpush.msrb.mxu0 %v496_v37  ;;  %v697_v34 = vld [vmem:[%s2640_s18 + $0x768] sm:$0xff] }
  0x66   : > { %v624_v39 = vld [vmem:[%s2640_s18 + $0x520] sm:$0xff]  ;;  %752 = vmatpush.msrb.mxu1 %v560_v38  ;;  %v497_v35 = vld [vmem:[%s2640_s18 + $0x128] sm:$0xff] }
  0x67   : > { %v688_v40 = vld [vmem:[%s2640_s18 + $0x720] sm:$0xff]  ;;  %772 = vmatpush.msrb.mxu2 %v624_v39  ;;  %v561_v36 = vld [vmem:[%s2640_s18 + $0x328] sm:$0xff] }
  0x68   : > { %v492_v41 = vld [vmem:[%s2640_s18 + $0x100] sm:$0xff]  ;;  %792 = vmatpush.msrb.mxu3 %v688_v40  ;;  %v629_v37 = vld [vmem:[%s2640_s18 + $0x548] sm:$0xff] }
  0x69   : > { %v556_v42 = vld [vmem:[%s2640_s18 + $0x300] sm:$0xff]  ;;  %733 = vmatpush.msrb.mxu0 %v492_v41  ;;  %v693_v38 = vld [vmem:[%s2640_s18 + $0x748] sm:$0xff] }
  0x6a   : > { %v620_v43 = vld [vmem:[%s2640_s18 + $0x500] sm:$0xff]  ;;  %753 = vmatpush.msrb.mxu1 %v556_v42  ;;  %v493_v39 = vld [vmem:[%s2640_s18 + $0x108] sm:$0xff] }
  0x6b   : > { %v684_v44 = vld [vmem:[%s2640_s18 + $0x700] sm:$0xff]  ;;  %773 = vmatpush.msrb.mxu2 %v620_v43  ;;  %v557_v40 = vld [vmem:[%s2640_s18 + $0x308] sm:$0xff] }
  0x6c   : > { %v488_v45 = vld [vmem:[%s2640_s18 + $0xe0] sm:$0xff]  ;;  %793 = vmatpush.msrb.mxu3 %v684_v44  ;;  %v625_v41 = vld [vmem:[%s2640_s18 + $0x528] sm:$0xff] }
  0x6d   : > { %v552_v46 = vld [vmem:[%s2640_s18 + $0x2e0] sm:$0xff]  ;;  %734 = vmatpush.msrb.mxu0 %v488_v45  ;;  %v689_v42 = vld [vmem:[%s2640_s18 + $0x728] sm:$0xff] }
  0x6e   : > { %v616_v47 = vld [vmem:[%s2640_s18 + $0x4e0] sm:$0xff]  ;;  %754 = vmatpush.msrb.mxu1 %v552_v46  ;;  %v489_v43 = vld [vmem:[%s2640_s18 + $0xe8] sm:$0xff] }
  0x6f   : > { %v680_v48 = vld [vmem:[%s2640_s18 + $0x6e0] sm:$0xff]  ;;  %774 = vmatpush.msrb.mxu2 %v616_v47  ;;  %v553_v44 = vld [vmem:[%s2640_s18 + $0x2e8] sm:$0xff] }
  0x70   : > { %v484_v49 = vld [vmem:[%s2640_s18 + $0xc0] sm:$0xff]  ;;  %794 = vmatpush.msrb.mxu3 %v680_v48  ;;  %v621_v45 = vld [vmem:[%s2640_s18 + $0x508] sm:$0xff] }
  0x71   : > { %v548_v50 = vld [vmem:[%s2640_s18 + $0x2c0] sm:$0xff]  ;;  %735 = vmatpush.msrb.mxu0 %v484_v49  ;;  %v685_v46 = vld [vmem:[%s2640_s18 + $0x708] sm:$0xff] }
  0x72   : > { %v612_v51 = vld [vmem:[%s2640_s18 + $0x4c0] sm:$0xff]  ;;  %755 = vmatpush.msrb.mxu1 %v548_v50  ;;  %v485_v47 = vld [vmem:[%s2640_s18 + $0xc8] sm:$0xff] }
  0x73   : > { %v676_v52 = vld [vmem:[%s2640_s18 + $0x6c0] sm:$0xff]  ;;  %775 = vmatpush.msrb.mxu2 %v612_v51  ;;  %v549_v48 = vld [vmem:[%s2640_s18 + $0x2c8] sm:$0xff] }
  0x74   : > { %v480_v53 = vld [vmem:[%s2640_s18 + $0xa0] sm:$0xff]  ;;  %795 = vmatpush.msrb.mxu3 %v676_v52  ;;  %v617_v49 = vld [vmem:[%s2640_s18 + $0x4e8] sm:$0xff] }
  0x75   : > { %v544_v54 = vld [vmem:[%s2640_s18 + $0x2a0] sm:$0xff]  ;;  %736 = vmatpush.msrb.mxu0 %v480_v53  ;;  %v681_v50 = vld [vmem:[%s2640_s18 + $0x6e8] sm:$0xff] }
  0x76   : > { %v608_v55 = vld [vmem:[%s2640_s18 + $0x4a0] sm:$0xff]  ;;  %756 = vmatpush.msrb.mxu1 %v544_v54  ;;  %v481_v51 = vld [vmem:[%s2640_s18 + $0xa8] sm:$0xff] }
  0x77   : > { %v672_v56 = vld [vmem:[%s2640_s18 + $0x6a0] sm:$0xff]  ;;  %776 = vmatpush.msrb.mxu2 %v608_v55  ;;  %v545_v52 = vld [vmem:[%s2640_s18 + $0x2a8] sm:$0xff] }
  0x78   : > { %v476_v57 = vld [vmem:[%s2640_s18 + $0x80] sm:$0xff]  ;;  %796 = vmatpush.msrb.mxu3 %v672_v56  ;;  %v613_v53 = vld [vmem:[%s2640_s18 + $0x4c8] sm:$0xff] }
  0x79   : > { %v540_v58 = vld [vmem:[%s2640_s18 + $0x280] sm:$0xff]  ;;  %737 = vmatpush.msrb.mxu0 %v476_v57  ;;  %v677_v54 = vld [vmem:[%s2640_s18 + $0x6c8] sm:$0xff] }
  0x7a   : > { %v604_v59 = vld [vmem:[%s2640_s18 + $0x480] sm:$0xff]  ;;  %757 = vmatpush.msrb.mxu1 %v540_v58  ;;  %v477_v55 = vld [vmem:[%s2640_s18 + $0x88] sm:$0xff] }
  0x7b   : > { %v668_v60 = vld [vmem:[%s2640_s18 + $0x680] sm:$0xff]  ;;  %777 = vmatpush.msrb.mxu2 %v604_v59  ;;  %v541_v56 = vld [vmem:[%s2640_s18 + $0x288] sm:$0xff] }
  0x7c   : > { %v472_v61 = vld [vmem:[%s2640_s18 + $0x60] sm:$0xff]  ;;  %797 = vmatpush.msrb.mxu3 %v668_v60  ;;  %v473_v57 = vld [vmem:[%s2640_s18 + $0x68] sm:$0xff] }
  0x7d   : > { %v536_v62 = vld [vmem:[%s2640_s18 + $0x260] sm:$0xff]  ;;  %738 = vmatpush.msrb.mxu0 %v472_v61  ;;  %v537_v58 = vld [vmem:[%s2640_s18 + $0x268] sm:$0xff] }
  0x7e   : > { %v600_v63 = vld [vmem:[%s2640_s18 + $0x460] sm:$0xff]  ;;  %758 = vmatpush.msrb.mxu1 %v536_v62  ;;  %v469_v59 = vld [vmem:[%s2640_s18 + $0x48] sm:$0xff] }
  0x7f   : > { %v664_v0 = vld [vmem:[%s2640_s18 + $0x660] sm:$0xff]  ;;  %778 = vmatpush.msrb.mxu2 %v600_v63  ;;  %v533_v60 = vld [vmem:[%s2640_s18 + $0x248] sm:$0xff] }
  0x80   : > { %v468_v1 = vld [vmem:[%s2640_s18 + $0x40] sm:$0xff]  ;;  %798 = vmatpush.msrb.mxu3 %v664_v0  ;;  %v609_v61 = vld [vmem:[%s2640_s18 + $0x4a8] sm:$0xff] }
  0x81   : > { %v532_v2 = vld [vmem:[%s2640_s18 + $0x240] sm:$0xff]  ;;  %739 = vmatpush.msrb.mxu0 %v468_v1  ;;  %v673_v62 = vld [vmem:[%s2640_s18 + $0x6a8] sm:$0xff] }
  0x82   : > { %v596_v3 = vld [vmem:[%s2640_s18 + $0x440] sm:$0xff]  ;;  %759 = vmatpush.msrb.mxu1 %v532_v2  ;;  %v465_v63 = vld [vmem:[%s2640_s18 + $0x28] sm:$0xff] }
  0x83   : > { %v660_v4 = vld [vmem:[%s2640_s18 + $0x640] sm:$0xff]  ;;  %779 = vmatpush.msrb.mxu2 %v596_v3  ;;  %v529_v0 = vld [vmem:[%s2640_s18 + $0x228] sm:$0xff] }
  0x84   : > { %v464_v5 = vld [vmem:[%s2640_s18 + $0x20] sm:$0xff]  ;;  %799 = vmatpush.msrb.mxu3 %v660_v4  ;;  %v605_v1 = vld [vmem:[%s2640_s18 + $0x488] sm:$0xff] }
  0x85   : > { %v528_v6 = vld [vmem:[%s2640_s18 + $0x220] sm:$0xff]  ;;  %740 = vmatpush.msrb.mxu0 %v464_v5  ;;  %v669_v2 = vld [vmem:[%s2640_s18 + $0x688] sm:$0xff] }
  0x86   : > { %v592_v7 = vld [vmem:[%s2640_s18 + $0x420] sm:$0xff]  ;;  %760 = vmatpush.msrb.mxu1 %v528_v6  ;;  %v461_v3 = vld [vmem:[%s2640_s18 + $0x8] sm:$0xff] }
  0x87   : > { %v656_v8 = vld [vmem:[%s2640_s18 + $0x620] sm:$0xff]  ;;  %780 = vmatpush.msrb.mxu2 %v592_v7  ;;  %v525_v4 = vld [vmem:[%s2640_s18 + $0x208] sm:$0xff] }
  0x88   : > { %v460_v9 = vld [vmem:[%s2640_s18] sm:$0xff]  ;;  %800 = vmatpush.msrb.mxu3 %v656_v8  ;;  %v601_v5 = vld [vmem:[%s2640_s18 + $0x468] sm:$0xff] }
  0x89   : > { %v524_v10 = vld [vmem:[%s2640_s18 + $0x200] sm:$0xff]  ;;  %741 = vmatpush.msrb.mxu0 %v460_v9  ;;  %v665_v6 = vld [vmem:[%s2640_s18 + $0x668] sm:$0xff] }
  0x8a   : > { %v588_v13 = vld [vmem:[%s2640_s18 + $0x400] sm:$0xff]  ;;  %761 = vmatpush.msrb.mxu1 %v524_v10  ;;  %v597_v7 = vld [vmem:[%s2640_s18 + $0x448] sm:$0xff] }
  0x8b   : > { %v652_v14 = vld [vmem:[%s2640_s18 + $0x600] sm:$0xff]  ;;  %806 = vmatpush.msra.mxu0 %v521_v11  ;;  %781 = vmatpush.msrb.mxu2 %v588_v13  ;;  %v661_v8 = vld [vmem:[%s2640_s18 + $0x648] sm:$0xff]  ;;  %v349_v13 = vld [vmem:[#allocation6] sm:$0xf] }
  0x8c   : > { %826 = vmatpush.msra.mxu1 %v585_v12  ;;  %801 = vmatpush.msrb.mxu3 %v652_v14  ;;  %v593_v9 = vld [vmem:[%s2640_s18 + $0x428] sm:$0xff]  ;;  %v351_v14 = vperm.slane %v349_v13, 0 }
  0x8d   : > { %807 = vmatpush.msra.mxu0 %v517_v15  ;;  %846 = vmatpush.msra.mxu2 %v649_v17  ;;  %v657_v10 = vld [vmem:[%s2640_s18 + $0x628] sm:$0xff]  ;;  %v352_v15 = vperm.slane %v349_v13, 1 }
  0x8e   : > { %827 = vmatpush.msra.mxu1 %v581_v16  ;;  %866 = vmatpush.msra.mxu3 %v713_v18  ;;  %v589_v11 = vld [vmem:[%s2640_s18 + $0x408] sm:$0xff] }
  0x8f   : > { %808 = vmatpush.msra.mxu0 %v513_v19  ;;  %847 = vmatpush.msra.mxu2 %v645_v21  ;;  %v653_v12 = vld [vmem:[%s2640_s18 + $0x608] sm:$0xff] }
  0x90   : > { %828 = vmatpush.msra.mxu1 %v577_v20  ;;  %867 = vmatpush.msra.mxu3 %v709_v22  ;;  %v522_v22 = vld [vmem:[%s2640_s18 + $0x1f0] sm:$0xff] }
  0x91   : > { %809 = vmatpush.msra.mxu0 %v509_v23  ;;  %848 = vmatpush.msra.mxu2 %v641_v25  ;;  %v586_v23 = vld [vmem:[%s2640_s18 + $0x3f0] sm:$0xff]  ;;  %v354_v25 = vperm.slane %v349_v13, 3 }
  0x92   : > { %829 = vmatpush.msra.mxu1 %v573_v24  ;;  %868 = vmatpush.msra.mxu3 %v705_v26  ;;  %v353_v24 = vperm.slane %v349_v13, 2  ;;  %v518_v26 = vld [vmem:[%s2640_s18 + $0x1d0] sm:$0xff] }
  0x93   : > { %810 = vmatpush.msra.mxu0 %v505_v27  ;;  %849 = vmatpush.msra.mxu2 %v637_v29  ;;  %v582_v27 = vld [vmem:[%s2640_s18 + $0x3d0] sm:$0xff] }
  0x94   : > { %830 = vmatpush.msra.mxu1 %v569_v28  ;;  %869 = vmatpush.msra.mxu3 %v701_v30  ;;  %v514_v30 = vld [vmem:[%s2640_s18 + $0x1b0] sm:$0xff] }
  0x95   : > { %811 = vmatpush.msra.mxu0 %v501_v31  ;;  %850 = vmatpush.msra.mxu2 %v633_v33  ;;  %v578_v31 = vld [vmem:[%s2640_s18 + $0x3b0] sm:$0xff] }
  0x96   : > { %831 = vmatpush.msra.mxu1 %v565_v32  ;;  %870 = vmatpush.msra.mxu3 %v697_v34  ;;  %v534_v13 = vld [vmem:[%s2640_s18 + $0x250] sm:$0xff] }
  0x97   : > { %812 = vmatpush.msra.mxu0 %v497_v35  ;;  %851 = vmatpush.msra.mxu2 %v629_v37  ;;  %v574_v37 = vld [vmem:[%s2640_s18 + $0x390] sm:$0xff] }
  0x98   : > { %832 = vmatpush.msra.mxu1 %v561_v36  ;;  %871 = vmatpush.msra.mxu3 %v693_v38  ;;  %v510_v36 = vld [vmem:[%s2640_s18 + $0x190] sm:$0xff] }
  0x99   : > { %813 = vmatpush.msra.mxu0 %v493_v39  ;;  %852 = vmatpush.msra.mxu2 %v625_v41  ;;  %v650_v38 = vld [vmem:[%s2640_s18 + $0x5f0] sm:$0xff] }
  0x9a   : > { %833 = vmatpush.msra.mxu1 %v557_v40  ;;  %872 = vmatpush.msra.mxu3 %v689_v42  ;;  %v714_v39 = vld [vmem:[%s2640_s18 + $0x7f0] sm:$0xff] }
  0x9b   : > { %814 = vmatpush.msra.mxu0 %v489_v43  ;;  %853 = vmatpush.msra.mxu2 %v621_v45  ;;  %v570_v40 = vld [vmem:[%s2640_s18 + $0x370] sm:$0xff] }
  0x9c   : > { %834 = vmatpush.msra.mxu1 %v553_v44  ;;  %873 = vmatpush.msra.mxu3 %v685_v46  ;;  %v506_v41 = vld [vmem:[%s2640_s18 + $0x170] sm:$0xff] }
  0x9d   : > { %815 = vmatpush.msra.mxu0 %v485_v47  ;;  %854 = vmatpush.msra.mxu2 %v617_v49  ;;  %v646_v42 = vld [vmem:[%s2640_s18 + $0x5d0] sm:$0xff] }
  0x9e   : > { %835 = vmatpush.msra.mxu1 %v549_v48  ;;  %874 = vmatpush.msra.mxu3 %v681_v50  ;;  %v710_v43 = vld [vmem:[%s2640_s18 + $0x7d0] sm:$0xff] }
  0x9f   : > { %816 = vmatpush.msra.mxu0 %v481_v51  ;;  %855 = vmatpush.msra.mxu2 %v613_v53  ;;  %v502_v44 = vld [vmem:[%s2640_s18 + $0x150] sm:$0xff] }
  0xa0   : > { %836 = vmatpush.msra.mxu1 %v545_v52  ;;  %875 = vmatpush.msra.mxu3 %v677_v54  ;;  %v566_v45 = vld [vmem:[%s2640_s18 + $0x350] sm:$0xff] }
  0xa1   : > { %817 = vmatpush.msra.mxu0 %v477_v55  ;;  %856 = vmatpush.msra.mxu2 %v609_v61  ;;  %v642_v46 = vld [vmem:[%s2640_s18 + $0x5b0] sm:$0xff] }
  0xa2   : > { %837 = vmatpush.msra.mxu1 %v541_v56  ;;  %876 = vmatpush.msra.mxu3 %v673_v62  ;;  %v706_v47 = vld [vmem:[%s2640_s18 + $0x7b0] sm:$0xff] }
  0xa3   : > { %818 = vmatpush.msra.mxu0 %v473_v57  ;;  %857 = vmatpush.msra.mxu2 %v605_v1  ;;  %v498_v48 = vld [vmem:[%s2640_s18 + $0x130] sm:$0xff] }
  0xa4   : > { %838 = vmatpush.msra.mxu1 %v537_v58  ;;  %877 = vmatpush.msra.mxu3 %v669_v2  ;;  %v562_v49 = vld [vmem:[%s2640_s18 + $0x330] sm:$0xff] }
  0xa5   : > { %819 = vmatpush.msra.mxu0 %v469_v59  ;;  %858 = vmatpush.msra.mxu2 %v601_v5  ;;  %v638_v50 = vld [vmem:[%s2640_s18 + $0x590] sm:$0xff] }
  0xa6   : > { %839 = vmatpush.msra.mxu1 %v533_v60  ;;  %878 = vmatpush.msra.mxu3 %v665_v6  ;;  %v702_v51 = vld [vmem:[%s2640_s18 + $0x790] sm:$0xff] }
  0xa7   : > { %820 = vmatpush.msra.mxu0 %v465_v63  ;;  %859 = vmatpush.msra.mxu2 %v597_v7  ;;  %v494_v52 = vld [vmem:[%s2640_s18 + $0x110] sm:$0xff] }
  0xa8   : > { %840 = vmatpush.msra.mxu1 %v529_v0  ;;  %879 = vmatpush.msra.mxu3 %v661_v8  ;;  %v558_v53 = vld [vmem:[%s2640_s18 + $0x310] sm:$0xff] }
  0xa9   : > { %821 = vmatpush.msra.mxu0 %v461_v3  ;;  %860 = vmatpush.msra.mxu2 %v593_v9  ;;  %v634_v54 = vld [vmem:[%s2640_s18 + $0x570] sm:$0xff] }
  0xaa   : > { %841 = vmatpush.msra.mxu1 %v525_v4  ;;  %880 = vmatpush.msra.mxu3 %v657_v10  ;;  %v698_v55 = vld [vmem:[%s2640_s18 + $0x770] sm:$0xff] }
  0xab   : > { %861 = vmatpush.msra.mxu2 %v589_v11  ;;  %v490_v56 = vld [vmem:[%s2640_s18 + $0xf0] sm:$0xff] }
  0xac   : > { %881 = vmatpush.msra.mxu3 %v653_v12  ;;  %v554_v57 = vld [vmem:[%s2640_s18 + $0x2f0] sm:$0xff] }
  0xad   : > { %v630_v58 = vld [vmem:[%s2640_s18 + $0x550] sm:$0xff] }
  0xae   : > { %v694_v59 = vld [vmem:[%s2640_s18 + $0x750] sm:$0xff] }
  0xaf   : > { %v486_v60 = vld [vmem:[%s2640_s18 + $0xd0] sm:$0xff] }
  0xb0   : > { %v550_v61 = vld [vmem:[%s2640_s18 + $0x2d0] sm:$0xff] }
  0xb1   : > { %v626_v62 = vld [vmem:[%s2640_s18 + $0x530] sm:$0xff] }
  0xb2   : > { %v690_v63 = vld [vmem:[%s2640_s18 + $0x730] sm:$0xff] }
  0xb3   : > { %v482_v0 = vld [vmem:[%s2640_s18 + $0xb0] sm:$0xff] }
  0xb4   : > { %v546_v1 = vld [vmem:[%s2640_s18 + $0x2b0] sm:$0xff] }
  0xb5   : > { %v622_v2 = vld [vmem:[%s2640_s18 + $0x510] sm:$0xff] }
  0xb6   : > { %v686_v3 = vld [vmem:[%s2640_s18 + $0x710] sm:$0xff] }
  0xb7   : > { %v478_v4 = vld [vmem:[%s2640_s18 + $0x90] sm:$0xff] }
  0xb8   : > { %v542_v5 = vld [vmem:[%s2640_s18 + $0x290] sm:$0xff] }
  0xb9   : > { %v618_v6 = vld [vmem:[%s2640_s18 + $0x4f0] sm:$0xff] }
  0xba   : > { %v682_v7 = vld [vmem:[%s2640_s18 + $0x6f0] sm:$0xff] }
  0xbb   : > { %v474_v8 = vld [vmem:[%s2640_s18 + $0x70] sm:$0xff] }
  0xbc   : > { %v538_v9 = vld [vmem:[%s2640_s18 + $0x270] sm:$0xff] }
  0xbd   : > { %v614_v10 = vld [vmem:[%s2640_s18 + $0x4d0] sm:$0xff] }
  0xbe   : > { %v678_v11 = vld [vmem:[%s2640_s18 + $0x6d0] sm:$0xff] }
  0xbf   : > { %v470_v12 = vld [vmem:[%s2640_s18 + $0x50] sm:$0xff] }
  0xcc   : > { %v393_v16 = vpop.f32.mrf.mxu0  ;;  %v413_v17 = vpop.f32.mrf.mxu1 }
  0xcd   : > { %v394_v18 = vadd.f32 %v393_v16, %v351_v14  ;;  %v414_v19 = vadd.f32 %v413_v17, %v352_v15  ;;  %v610_v14 = vld [vmem:[%s2640_s18 + $0x4b0] sm:$0xff] }
  0xce   : > { %v674_v15 = vld [vmem:[%s2640_s18 + $0x6b0] sm:$0xff] }
  0xcf   : > { %v2778_v20 = vmax.f32 %v394_v18, 0.0  ;;  %v2780_v21 = vmax.f32 %v414_v19, 0.0  ;;  %v466_v16 = vld [vmem:[%s2640_s18 + $0x30] sm:$0xff] }
  0xd0   : > { %v530_v17 = vld [vmem:[%s2640_s18 + $0x230] sm:$0xff] }
  0xd1   : > { %742 = vmatmul.f32.vlgmr.msrb.gmra.mxu0 %v2778_v20  ;;  %762 = vmatmul.f32.vlgmr.msrb.gmra.mxu1 %v2780_v21  ;;  %v606_v18 = vld [vmem:[%s2640_s18 + $0x490] sm:$0xff] }
  0xd2   : > { %886 = vmatpush.msrb.mxu0 %v522_v22  ;;  %906 = vmatpush.msrb.mxu1 %v586_v23  ;;  %v670_v19 = vld [vmem:[%s2640_s18 + $0x690] sm:$0xff] }
  0xd3   : > { %v433_v28 = vpop.f32.mrf.mxu2  ;;  %v453_v29 = vpop.f32.mrf.mxu3  ;;  %v462_v22 = vld [vmem:[%s2640_s18 + $0x10] sm:$0xff] }
  0xd4   : > { %v434_v32 = vadd.f32 %v433_v28, %v353_v24  ;;  %v454_v33 = vadd.f32 %v453_v29, %v354_v25  ;;  %887 = vmatpush.msrb.mxu0 %v518_v26  ;;  %907 = vmatpush.msrb.mxu1 %v582_v27  ;;  %v526_v23 = vld [vmem:[%s2640_s18 + $0x210] sm:$0xff]  ;;  %v523_v26 = vld [vmem:[%s2640_s18 + $0x1f8] sm:$0xff] }
  0xd5   : > { %v602_v24 = vld [vmem:[%s2640_s18 + $0x470] sm:$0xff]  ;;  %v587_v27 = vld [vmem:[%s2640_s18 + $0x3f8] sm:$0xff] }
  0xd6   : > { %v2790_v34 = vmax.f32 %v434_v32, 0.0  ;;  %v2792_v35 = vmax.f32 %v454_v33, 0.0  ;;  %888 = vmatpush.msrb.mxu0 %v514_v30  ;;  %908 = vmatpush.msrb.mxu1 %v578_v31  ;;  %v666_v25 = vld [vmem:[%s2640_s18 + $0x670] sm:$0xff]  ;;  %v519_v30 = vld [vmem:[%s2640_s18 + $0x1d8] sm:$0xff] }
  0xd7   : > { %v598_v28 = vld [vmem:[%s2640_s18 + $0x450] sm:$0xff]  ;;  %v583_v31 = vld [vmem:[%s2640_s18 + $0x3d8] sm:$0xff] }
  0xd8   : > { %782 = vmatmul.f32.vlgmr.msrb.gmra.mxu2 %v2790_v34  ;;  %802 = vmatmul.f32.vlgmr.msrb.gmra.mxu3 %v2792_v35  ;;  %v662_v29 = vld [vmem:[%s2640_s18 + $0x650] sm:$0xff] }
  0xd9   : > { %889 = vmatpush.msrb.mxu0 %v510_v36  ;;  %909 = vmatpush.msrb.mxu1 %v574_v37  ;;  %v594_v32 = vld [vmem:[%s2640_s18 + $0x430] sm:$0xff]  ;;  %v515_v36 = vld [vmem:[%s2640_s18 + $0x1b8] sm:$0xff] }
  0xda   : > { %926 = vmatpush.msrb.mxu2 %v650_v38  ;;  %946 = vmatpush.msrb.mxu3 %v714_v39  ;;  %v658_v33 = vld [vmem:[%s2640_s18 + $0x630] sm:$0xff]  ;;  %v579_v37 = vld [vmem:[%s2640_s18 + $0x3b8] sm:$0xff] }
  0xdb   : > { %822 = vmatmul.f32.vlgmr.msra.gmra.mxu0 %v2778_v20  ;;  %910 = vmatpush.msrb.mxu1 %v570_v40  ;;  %v590_v38 = vld [vmem:[%s2640_s18 + $0x410] sm:$0xff]  ;;  %v511_v40 = vld [vmem:[%s2640_s18 + $0x198] sm:$0xff] }
  0xdc   : > { %890 = vmatpush.msrb.mxu0 %v506_v41  ;;  %927 = vmatpush.msrb.mxu2 %v646_v42  ;;  %v654_v39 = vld [vmem:[%s2640_s18 + $0x610] sm:$0xff]  ;;  %v575_v41 = vld [vmem:[%s2640_s18 + $0x398] sm:$0xff] }
  0xdd   : > { %947 = vmatpush.msrb.mxu3 %v710_v43  ;;  %842 = vmatmul.f32.vlgmr.msra.gmra.mxu1 %v2780_v21  ;;  %v651_v42 = vld [vmem:[%s2640_s18 + $0x5f8] sm:$0xff] }
  0xde   : > { %891 = vmatpush.msrb.mxu0 %v502_v44  ;;  %911 = vmatpush.msrb.mxu1 %v566_v45  ;;  %v715_v43 = vld [vmem:[%s2640_s18 + $0x7f8] sm:$0xff] }
  0xdf   : > { %928 = vmatpush.msrb.mxu2 %v642_v46  ;;  %948 = vmatpush.msrb.mxu3 %v706_v47  ;;  %v507_v44 = vld [vmem:[%s2640_s18 + $0x178] sm:$0xff] }
  0xe0   : > { %892 = vmatpush.msrb.mxu0 %v498_v48  ;;  %912 = vmatpush.msrb.mxu1 %v562_v49  ;;  %v571_v45 = vld [vmem:[%s2640_s18 + $0x378] sm:$0xff] }
  0xe1   : > { %929 = vmatpush.msrb.mxu2 %v638_v50  ;;  %949 = vmatpush.msrb.mxu3 %v702_v51  ;;  %v647_v46 = vld [vmem:[%s2640_s18 + $0x5d8] sm:$0xff] }
  0xe2   : > { %862 = vmatmul.f32.vlgmr.msra.gmra.mxu2 %v2790_v34  ;;  %882 = vmatmul.f32.vlgmr.msra.gmra.mxu3 %v2792_v35  ;;  %v711_v47 = vld [vmem:[%s2640_s18 + $0x7d8] sm:$0xff] }
  0xe3   : > { %893 = vmatpush.msrb.mxu0 %v494_v52  ;;  %913 = vmatpush.msrb.mxu1 %v558_v53  ;;  %v503_v48 = vld [vmem:[%s2640_s18 + $0x158] sm:$0xff] }
  0xe4   : > { %930 = vmatpush.msrb.mxu2 %v634_v54  ;;  %950 = vmatpush.msrb.mxu3 %v698_v55  ;;  %v567_v49 = vld [vmem:[%s2640_s18 + $0x358] sm:$0xff] }
  0xe5   : > { %894 = vmatpush.msrb.mxu0 %v490_v56  ;;  %914 = vmatpush.msrb.mxu1 %v554_v57  ;;  %v643_v50 = vld [vmem:[%s2640_s18 + $0x5b8] sm:$0xff] }
  0xe6   : > { %931 = vmatpush.msrb.mxu2 %v630_v58  ;;  %951 = vmatpush.msrb.mxu3 %v694_v59  ;;  %v707_v51 = vld [vmem:[%s2640_s18 + $0x7b8] sm:$0xff] }
  0xe7   : > { %895 = vmatpush.msrb.mxu0 %v486_v60  ;;  %915 = vmatpush.msrb.mxu1 %v550_v61  ;;  %v499_v52 = vld [vmem:[%s2640_s18 + $0x138] sm:$0xff] }
  0xe8   : > { %932 = vmatpush.msrb.mxu2 %v626_v62  ;;  %952 = vmatpush.msrb.mxu3 %v690_v63  ;;  %v563_v53 = vld [vmem:[%s2640_s18 + $0x338] sm:$0xff] }
  0xe9   : > { %896 = vmatpush.msrb.mxu0 %v482_v0  ;;  %916 = vmatpush.msrb.mxu1 %v546_v1  ;;  %v639_v54 = vld [vmem:[%s2640_s18 + $0x598] sm:$0xff] }
  0xea   : > { %933 = vmatpush.msrb.mxu2 %v622_v2  ;;  %953 = vmatpush.msrb.mxu3 %v686_v3  ;;  %v703_v55 = vld [vmem:[%s2640_s18 + $0x798] sm:$0xff] }
  0xeb   : > { %897 = vmatpush.msrb.mxu0 %v478_v4  ;;  %917 = vmatpush.msrb.mxu1 %v542_v5  ;;  %v495_v56 = vld [vmem:[%s2640_s18 + $0x118] sm:$0xff] }
  0xec   : > { %934 = vmatpush.msrb.mxu2 %v618_v6  ;;  %954 = vmatpush.msrb.mxu3 %v682_v7  ;;  %v559_v57 = vld [vmem:[%s2640_s18 + $0x318] sm:$0xff] }
  0xed   : > { %898 = vmatpush.msrb.mxu0 %v474_v8  ;;  %918 = vmatpush.msrb.mxu1 %v538_v9  ;;  %v635_v58 = vld [vmem:[%s2640_s18 + $0x578] sm:$0xff] }
  0xee   : > { %935 = vmatpush.msrb.mxu2 %v614_v10  ;;  %955 = vmatpush.msrb.mxu3 %v678_v11  ;;  %v699_v59 = vld [vmem:[%s2640_s18 + $0x778] sm:$0xff] }
  0xef   : > { %899 = vmatpush.msrb.mxu0 %v470_v12  ;;  %919 = vmatpush.msrb.mxu1 %v534_v13  ;;  %v491_v60 = vld [vmem:[%s2640_s18 + $0xf8] sm:$0xff] }
  0xf0   : > { %936 = vmatpush.msrb.mxu2 %v610_v14  ;;  %956 = vmatpush.msrb.mxu3 %v674_v15  ;;  %v555_v61 = vld [vmem:[%s2640_s18 + $0x2f8] sm:$0xff] }
  0xf1   : > { %900 = vmatpush.msrb.mxu0 %v466_v16  ;;  %920 = vmatpush.msrb.mxu1 %v530_v17  ;;  %v631_v62 = vld [vmem:[%s2640_s18 + $0x558] sm:$0xff] }
  0xf2   : > { %937 = vmatpush.msrb.mxu2 %v606_v18  ;;  %957 = vmatpush.msrb.mxu3 %v670_v19  ;;  %v695_v63 = vld [vmem:[%s2640_s18 + $0x758] sm:$0xff] }
  0xf3   : > { %901 = vmatpush.msrb.mxu0 %v462_v22  ;;  %921 = vmatpush.msrb.mxu1 %v526_v23  ;;  %v487_v0 = vld [vmem:[%s2640_s18 + $0xd8] sm:$0xff] }
  0xf4   : > { %938 = vmatpush.msrb.mxu2 %v602_v24  ;;  %958 = vmatpush.msrb.mxu3 %v666_v25  ;;  %v551_v1 = vld [vmem:[%s2640_s18 + $0x2d8] sm:$0xff] }
  0xf5   : > { %902 = vmatmul.f32.vlgmr.msrb.gmra.mxu0 %v2778_v20  ;;  %922 = vmatmul.f32.vlgmr.msrb.gmra.mxu1 %v2780_v21  ;;  %v627_v2 = vld [vmem:[%s2640_s18 + $0x538] sm:$0xff] }
  0xf6   : > { %966 = vmatpush.msra.mxu0 %v523_v26  ;;  %986 = vmatpush.msra.mxu1 %v587_v27  ;;  %v691_v3 = vld [vmem:[%s2640_s18 + $0x738] sm:$0xff] }
  0xf7   : > { %939 = vmatpush.msrb.mxu2 %v598_v28  ;;  %959 = vmatpush.msrb.mxu3 %v662_v29  ;;  %v483_v4 = vld [vmem:[%s2640_s18 + $0xb8] sm:$0xff] }
  0xf8   : > { %967 = vmatpush.msra.mxu0 %v519_v30  ;;  %987 = vmatpush.msra.mxu1 %v583_v31  ;;  %v547_v5 = vld [vmem:[%s2640_s18 + $0x2b8] sm:$0xff]  ;;  %v1969_v30 = vld [vmem:[%s2640_s18 + $0x9e0] sm:$0xff] }
  0xf9   : > { %940 = vmatpush.msrb.mxu2 %v594_v32  ;;  %960 = vmatpush.msrb.mxu3 %v658_v33  ;;  %v623_v6 = vld [vmem:[%s2640_s18 + $0x518] sm:$0xff]  ;;  %v2033_v31 = vld [vmem:[%s2640_s18 + $0xbe0] sm:$0xff] }
  0xfa   : > { %968 = vmatpush.msra.mxu0 %v515_v36  ;;  %988 = vmatpush.msra.mxu1 %v579_v37  ;;  %v687_v7 = vld [vmem:[%s2640_s18 + $0x718] sm:$0xff]  ;;  %v1965_v36 = vld [vmem:[%s2640_s18 + $0x9c0] sm:$0xff] }
  0xfb   : > { %941 = vmatpush.msrb.mxu2 %v590_v38  ;;  %961 = vmatpush.msrb.mxu3 %v654_v39  ;;  %v479_v8 = vld [vmem:[%s2640_s18 + $0x98] sm:$0xff]  ;;  %v2029_v37 = vld [vmem:[%s2640_s18 + $0xbc0] sm:$0xff] }
  0xfc   : > { %942 = vmatmul.f32.vlgmr.msrb.gmra.mxu2 %v2790_v34  ;;  %962 = vmatmul.f32.vlgmr.msrb.gmra.mxu3 %v2792_v35  ;;  %v543_v9 = vld [vmem:[%s2640_s18 + $0x298] sm:$0xff] }
  0xfd   : > { %969 = vmatpush.msra.mxu0 %v511_v40  ;;  %989 = vmatpush.msra.mxu1 %v575_v41  ;;  %v619_v10 = vld [vmem:[%s2640_s18 + $0x4f8] sm:$0xff]  ;;  %v1961_v40 = vld [vmem:[%s2640_s18 + $0x9a0] sm:$0xff] }
  0xfe   : > { %1006 = vmatpush.msra.mxu2 %v651_v42  ;;  %1026 = vmatpush.msra.mxu3 %v715_v43  ;;  %v683_v11 = vld [vmem:[%s2640_s18 + $0x6f8] sm:$0xff]  ;;  %v2025_v41 = vld [vmem:[%s2640_s18 + $0xba0] sm:$0xff] }
  0xff   : > { %970 = vmatpush.msra.mxu0 %v507_v44  ;;  %990 = vmatpush.msra.mxu1 %v571_v45  ;;  %v475_v12 = vld [vmem:[%s2640_s18 + $0x78] sm:$0xff]  ;;  %v1957_v44 = vld [vmem:[%s2640_s18 + $0x980] sm:$0xff] }
 0x100   : > { %1007 = vmatpush.msra.mxu2 %v647_v46  ;;  %1027 = vmatpush.msra.mxu3 %v711_v47  ;;  %v539_v13 = vld [vmem:[%s2640_s18 + $0x278] sm:$0xff]  ;;  %v2021_v45 = vld [vmem:[%s2640_s18 + $0xb80] sm:$0xff] }
 0x101   : > { %971 = vmatpush.msra.mxu0 %v503_v48  ;;  %991 = vmatpush.msra.mxu1 %v567_v49  ;;  %v615_v14 = vld [vmem:[%s2640_s18 + $0x4d8] sm:$0xff]  ;;  %v2097_v46 = vld [vmem:[%s2640_s18 + $0xde0] sm:$0xff] }
 0x102   : > { %1008 = vmatpush.msra.mxu2 %v643_v50  ;;  %1028 = vmatpush.msra.mxu3 %v707_v51  ;;  %v679_v15 = vld [vmem:[%s2640_s18 + $0x6d8] sm:$0xff]  ;;  %v2161_v47 = vld [vmem:[%s2640_s18 + $0xfe0] sm:$0xff] }
 0x103   : > { %972 = vmatpush.msra.mxu0 %v499_v52  ;;  %992 = vmatpush.msra.mxu1 %v563_v53  ;;  %v471_v16 = vld [vmem:[%s2640_s18 + $0x58] sm:$0xff]  ;;  %v1953_v48 = vld [vmem:[%s2640_s18 + $0x960] sm:$0xff] }
 0x104   : > { %1009 = vmatpush.msra.mxu2 %v639_v54  ;;  %1029 = vmatpush.msra.mxu3 %v703_v55  ;;  %v535_v17 = vld [vmem:[%s2640_s18 + $0x258] sm:$0xff]  ;;  %v2017_v49 = vld [vmem:[%s2640_s18 + $0xb60] sm:$0xff] }
 0x105   : > { %973 = vmatpush.msra.mxu0 %v495_v56  ;;  %993 = vmatpush.msra.mxu1 %v559_v57  ;;  %v611_v18 = vld [vmem:[%s2640_s18 + $0x4b8] sm:$0xff]  ;;  %v2093_v50 = vld [vmem:[%s2640_s18 + $0xdc0] sm:$0xff] }
 0x106   : > { %1010 = vmatpush.msra.mxu2 %v635_v58  ;;  %1030 = vmatpush.msra.mxu3 %v699_v59  ;;  %v675_v19 = vld [vmem:[%s2640_s18 + $0x6b8] sm:$0xff]  ;;  %v2157_v51 = vld [vmem:[%s2640_s18 + $0xfc0] sm:$0xff] }
 0x107   : > { %974 = vmatpush.msra.mxu0 %v491_v60  ;;  %994 = vmatpush.msra.mxu1 %v555_v61  ;;  %v467_v22 = vld [vmem:[%s2640_s18 + $0x38] sm:$0xff]  ;;  %v1949_v52 = vld [vmem:[%s2640_s18 + $0x940] sm:$0xff] }
 0x108   : > { %1011 = vmatpush.msra.mxu2 %v631_v62  ;;  %1031 = vmatpush.msra.mxu3 %v695_v63  ;;  %v531_v23 = vld [vmem:[%s2640_s18 + $0x238] sm:$0xff]  ;;  %v2013_v53 = vld [vmem:[%s2640_s18 + $0xb40] sm:$0xff] }
 0x109   : > { %975 = vmatpush.msra.mxu0 %v487_v0  ;;  %995 = vmatpush.msra.mxu1 %v551_v1  ;;  %v607_v24 = vld [vmem:[%s2640_s18 + $0x498] sm:$0xff]  ;;  %v2089_v54 = vld [vmem:[%s2640_s18 + $0xda0] sm:$0xff] }
 0x10a   : > { %1012 = vmatpush.msra.mxu2 %v627_v2  ;;  %1032 = vmatpush.msra.mxu3 %v691_v3  ;;  %v671_v25 = vld [vmem:[%s2640_s18 + $0x698] sm:$0xff]  ;;  %v2153_v55 = vld [vmem:[%s2640_s18 + $0xfa0] sm:$0xff] }
 0x10b   : > { %976 = vmatpush.msra.mxu0 %v483_v4  ;;  %996 = vmatpush.msra.mxu1 %v547_v5  ;;  %v463_v26 = vld [vmem:[%s2640_s18 + $0x18] sm:$0xff]  ;;  %v1945_v56 = vld [vmem:[%s2640_s18 + $0x920] sm:$0xff] }
 0x10c   : > { %1013 = vmatpush.msra.mxu2 %v623_v6  ;;  %1033 = vmatpush.msra.mxu3 %v687_v7  ;;  %v527_v27 = vld [vmem:[%s2640_s18 + $0x218] sm:$0xff]  ;;  %v2009_v57 = vld [vmem:[%s2640_s18 + $0xb20] sm:$0xff] }
 0x10d   : > { %977 = vmatpush.msra.mxu0 %v479_v8  ;;  %997 = vmatpush.msra.mxu1 %v543_v9  ;;  %v603_v28 = vld [vmem:[%s2640_s18 + $0x478] sm:$0xff]  ;;  %v2085_v58 = vld [vmem:[%s2640_s18 + $0xd80] sm:$0xff] }
 0x10e   : > { %1014 = vmatpush.msra.mxu2 %v619_v10  ;;  %1034 = vmatpush.msra.mxu3 %v683_v11  ;;  %v667_v29 = vld [vmem:[%s2640_s18 + $0x678] sm:$0xff]  ;;  %v2149_v59 = vld [vmem:[%s2640_s18 + $0xf80] sm:$0xff] }
 0x10f   : > { %978 = vmatpush.msra.mxu0 %v475_v12  ;;  %998 = vmatpush.msra.mxu1 %v539_v13  ;;  %v599_v32 = vld [vmem:[%s2640_s18 + $0x458] sm:$0xff]  ;;  %v1941_v60 = vld [vmem:[%s2640_s18 + $0x900] sm:$0xff] }
 0x110   : > { %1015 = vmatpush.msra.mxu2 %v615_v14  ;;  %1035 = vmatpush.msra.mxu3 %v679_v15  ;;  %v663_v33 = vld [vmem:[%s2640_s18 + $0x658] sm:$0xff]  ;;  %v2005_v61 = vld [vmem:[%s2640_s18 + $0xb00] sm:$0xff] }
 0x111   : > { %979 = vmatpush.msra.mxu0 %v471_v16  ;;  %999 = vmatpush.msra.mxu1 %v535_v17  ;;  %v595_v38 = vld [vmem:[%s2640_s18 + $0x438] sm:$0xff]  ;;  %v2081_v62 = vld [vmem:[%s2640_s18 + $0xd60] sm:$0xff] }
 0x112   : > { %1016 = vmatpush.msra.mxu2 %v611_v18  ;;  %1036 = vmatpush.msra.mxu3 %v675_v19  ;;  %v659_v39 = vld [vmem:[%s2640_s18 + $0x638] sm:$0xff]  ;;  %v2145_v63 = vld [vmem:[%s2640_s18 + $0xf60] sm:$0xff] }
 0x113   : > { %980 = vmatpush.msra.mxu0 %v467_v22  ;;  %1000 = vmatpush.msra.mxu1 %v531_v23  ;;  %v591_v42 = vld [vmem:[%s2640_s18 + $0x418] sm:$0xff]  ;;  %v1937_v0 = vld [vmem:[%s2640_s18 + $0x8e0] sm:$0xff] }
 0x114   : > { %1017 = vmatpush.msra.mxu2 %v607_v24  ;;  %1037 = vmatpush.msra.mxu3 %v671_v25  ;;  %v655_v43 = vld [vmem:[%s2640_s18 + $0x618] sm:$0xff]  ;;  %v2001_v1 = vld [vmem:[%s2640_s18 + $0xae0] sm:$0xff] }
 0x115   : > { %981 = vmatpush.msra.mxu0 %v463_v26  ;;  %1001 = vmatpush.msra.mxu1 %v527_v27  ;;  %v2077_v2 = vld [vmem:[%s2640_s18 + $0xd40] sm:$0xff] }
 0x116   : > { %1018 = vmatpush.msra.mxu2 %v603_v28  ;;  %1038 = vmatpush.msra.mxu3 %v667_v29  ;;  %v2141_v3 = vld [vmem:[%s2640_s18 + $0xf40] sm:$0xff] }
 0x117   : > { %982 = vmatmul.f32.vlgmr.msra.gmra.mxu0 %v2778_v20  ;;  %1002 = vmatmul.f32.vlgmr.msra.gmra.mxu1 %v2780_v21  ;;  %v1933_v4 = vld [vmem:[%s2640_s18 + $0x8c0] sm:$0xff] }
 0x118   : > { %1380 = vmatpush.msrb.mxu0 %v1969_v30  ;;  %1400 = vmatpush.msrb.mxu1 %v2033_v31  ;;  %v1997_v5 = vld [vmem:[%s2640_s18 + $0xac0] sm:$0xff] }
 0x119   : > { %1019 = vmatpush.msra.mxu2 %v599_v32  ;;  %1039 = vmatpush.msra.mxu3 %v663_v33  ;;  %v2073_v6 = vld [vmem:[%s2640_s18 + $0xd20] sm:$0xff] }
 0x11a   : > { %1381 = vmatpush.msrb.mxu0 %v1965_v36  ;;  %1401 = vmatpush.msrb.mxu1 %v2029_v37  ;;  %v2137_v7 = vld [vmem:[%s2640_s18 + $0xf20] sm:$0xff]  ;;  %v1970_v36 = vld [vmem:[%s2640_s18 + $0x9e8] sm:$0xff] }
 0x11b   : > { %1020 = vmatpush.msra.mxu2 %v595_v38  ;;  %1040 = vmatpush.msra.mxu3 %v659_v39  ;;  %v1929_v8 = vld [vmem:[%s2640_s18 + $0x8a0] sm:$0xff]  ;;  %v2034_v37 = vld [vmem:[%s2640_s18 + $0xbe8] sm:$0xff] }
 0x11c   : > { %1382 = vmatpush.msrb.mxu0 %v1961_v40  ;;  %1402 = vmatpush.msrb.mxu1 %v2025_v41  ;;  %v1993_v9 = vld [vmem:[%s2640_s18 + $0xaa0] sm:$0xff]  ;;  %v1966_v40 = vld [vmem:[%s2640_s18 + $0x9c8] sm:$0xff] }
 0x11d   : > { %1021 = vmatpush.msra.mxu2 %v591_v42  ;;  %1041 = vmatpush.msra.mxu3 %v655_v43  ;;  %v2069_v10 = vld [vmem:[%s2640_s18 + $0xd00] sm:$0xff]  ;;  %v2030_v41 = vld [vmem:[%s2640_s18 + $0xbc8] sm:$0xff] }
 0x11e   : > { %1022 = vmatmul.f32.vlgmr.msra.gmra.mxu2 %v2790_v34  ;;  %1042 = vmatmul.f32.vlgmr.msra.gmra.mxu3 %v2792_v35  ;;  %v2133_v11 = vld [vmem:[%s2640_s18 + $0xf00] sm:$0xff] }
 0x11f   : > { %1383 = vmatpush.msrb.mxu0 %v1957_v44  ;;  %1403 = vmatpush.msrb.mxu1 %v2021_v45  ;;  %v1925_v12 = vld [vmem:[%s2640_s18 + $0x880] sm:$0xff]  ;;  %v1962_v44 = vld [vmem:[%s2640_s18 + $0x9a8] sm:$0xff] }
 0x120   : > { %1420 = vmatpush.msrb.mxu2 %v2097_v46  ;;  %1440 = vmatpush.msrb.mxu3 %v2161_v47  ;;  %v1989_v13 = vld [vmem:[%s2640_s18 + $0xa80] sm:$0xff]  ;;  %v2026_v45 = vld [vmem:[%s2640_s18 + $0xba8] sm:$0xff] }
 0x121   : > { %1384 = vmatpush.msrb.mxu0 %v1953_v48  ;;  %1404 = vmatpush.msrb.mxu1 %v2017_v49  ;;  %v2065_v14 = vld [vmem:[%s2640_s18 + $0xce0] sm:$0xff]  ;;  %v1958_v48 = vld [vmem:[%s2640_s18 + $0x988] sm:$0xff] }
 0x122   : > { %1421 = vmatpush.msrb.mxu2 %v2093_v50  ;;  %1441 = vmatpush.msrb.mxu3 %v2157_v51  ;;  %v2129_v15 = vld [vmem:[%s2640_s18 + $0xee0] sm:$0xff]  ;;  %v2022_v49 = vld [vmem:[%s2640_s18 + $0xb88] sm:$0xff] }
 0x123   : > { %1385 = vmatpush.msrb.mxu0 %v1949_v52  ;;  %1405 = vmatpush.msrb.mxu1 %v2013_v53  ;;  %v1921_v16 = vld [vmem:[%s2640_s18 + $0x860] sm:$0xff]  ;;  %v2098_v50 = vld [vmem:[%s2640_s18 + $0xde8] sm:$0xff] }
 0x124   : > { %1422 = vmatpush.msrb.mxu2 %v2089_v54  ;;  %1442 = vmatpush.msrb.mxu3 %v2153_v55  ;;  %v1985_v17 = vld [vmem:[%s2640_s18 + $0xa60] sm:$0xff]  ;;  %v2162_v51 = vld [vmem:[%s2640_s18 + $0xfe8] sm:$0xff] }
 0x125   : > { %1386 = vmatpush.msrb.mxu0 %v1945_v56  ;;  %1406 = vmatpush.msrb.mxu1 %v2009_v57  ;;  %v2061_v18 = vld [vmem:[%s2640_s18 + $0xcc0] sm:$0xff]  ;;  %v1954_v52 = vld [vmem:[%s2640_s18 + $0x968] sm:$0xff] }
 0x126   : > { %1423 = vmatpush.msrb.mxu2 %v2085_v58  ;;  %1443 = vmatpush.msrb.mxu3 %v2149_v59  ;;  %v2125_v19 = vld [vmem:[%s2640_s18 + $0xec0] sm:$0xff]  ;;  %v2018_v53 = vld [vmem:[%s2640_s18 + $0xb68] sm:$0xff] }
 0x127   : > { %1387 = vmatpush.msrb.mxu0 %v1941_v60  ;;  %1407 = vmatpush.msrb.mxu1 %v2005_v61  ;;  %v1917_v22 = vld [vmem:[%s2640_s18 + $0x840] sm:$0xff]  ;;  %v2094_v54 = vld [vmem:[%s2640_s18 + $0xdc8] sm:$0xff] }
 0x128   : > { %1424 = vmatpush.msrb.mxu2 %v2081_v62  ;;  %1444 = vmatpush.msrb.mxu3 %v2145_v63  ;;  %v1981_v23 = vld [vmem:[%s2640_s18 + $0xa40] sm:$0xff]  ;;  %v2158_v55 = vld [vmem:[%s2640_s18 + $0xfc8] sm:$0xff] }
 0x129   : > { %1388 = vmatpush.msrb.mxu0 %v1937_v0  ;;  %1408 = vmatpush.msrb.mxu1 %v2001_v1  ;;  %v2057_v24 = vld [vmem:[%s2640_s18 + $0xca0] sm:$0xff]  ;;  %v1950_v56 = vld [vmem:[%s2640_s18 + $0x948] sm:$0xff] }
 0x12a   : > { %1425 = vmatpush.msrb.mxu2 %v2077_v2  ;;  %1445 = vmatpush.msrb.mxu3 %v2141_v3  ;;  %v2121_v25 = vld [vmem:[%s2640_s18 + $0xea0] sm:$0xff]  ;;  %v2014_v57 = vld [vmem:[%s2640_s18 + $0xb48] sm:$0xff] }
 0x12b   : > { %1389 = vmatpush.msrb.mxu0 %v1933_v4  ;;  %1409 = vmatpush.msrb.mxu1 %v1997_v5  ;;  %v1913_v26 = vld [vmem:[%s2640_s18 + $0x820] sm:$0xff]  ;;  %v2090_v58 = vld [vmem:[%s2640_s18 + $0xda8] sm:$0xff] }
 0x12c   : > { %1426 = vmatpush.msrb.mxu2 %v2073_v6  ;;  %1446 = vmatpush.msrb.mxu3 %v2137_v7  ;;  %v1977_v27 = vld [vmem:[%s2640_s18 + $0xa20] sm:$0xff]  ;;  %v2154_v59 = vld [vmem:[%s2640_s18 + $0xfa8] sm:$0xff] }
 0x12d   : > { %1390 = vmatpush.msrb.mxu0 %v1929_v8  ;;  %1410 = vmatpush.msrb.mxu1 %v1993_v9  ;;  %v2053_v28 = vld [vmem:[%s2640_s18 + $0xc80] sm:$0xff]  ;;  %v1946_v60 = vld [vmem:[%s2640_s18 + $0x928] sm:$0xff] }
 0x12e   : > { %1427 = vmatpush.msrb.mxu2 %v2069_v10  ;;  %1447 = vmatpush.msrb.mxu3 %v2133_v11  ;;  %v2117_v29 = vld [vmem:[%s2640_s18 + $0xe80] sm:$0xff]  ;;  %v2010_v61 = vld [vmem:[%s2640_s18 + $0xb28] sm:$0xff] }
 0x12f   : > { %1391 = vmatpush.msrb.mxu0 %v1925_v12  ;;  %1411 = vmatpush.msrb.mxu1 %v1989_v13  ;;  %v1909_v30 = vld [vmem:[%s2640_s18 + $0x800] sm:$0xff]  ;;  %v2086_v62 = vld [vmem:[%s2640_s18 + $0xd88] sm:$0xff] }
 0x130   : > { %1428 = vmatpush.msrb.mxu2 %v2065_v14  ;;  %1448 = vmatpush.msrb.mxu3 %v2129_v15  ;;  %v1973_v31 = vld [vmem:[%s2640_s18 + $0xa00] sm:$0xff]  ;;  %v2150_v63 = vld [vmem:[%s2640_s18 + $0xf88] sm:$0xff] }
 0x131   : > { %1392 = vmatpush.msrb.mxu0 %v1921_v16  ;;  %1412 = vmatpush.msrb.mxu1 %v1985_v17  ;;  %v2049_v32 = vld [vmem:[%s2640_s18 + $0xc60] sm:$0xff]  ;;  %v1942_v0 = vld [vmem:[%s2640_s18 + $0x908] sm:$0xff] }
 0x132   : > { %1429 = vmatpush.msrb.mxu2 %v2061_v18  ;;  %1449 = vmatpush.msrb.mxu3 %v2125_v19  ;;  %v2113_v33 = vld [vmem:[%s2640_s18 + $0xe60] sm:$0xff]  ;;  %v2006_v1 = vld [vmem:[%s2640_s18 + $0xb08] sm:$0xff] }
 0x133   : > { %1393 = vmatpush.msrb.mxu0 %v1917_v22  ;;  %1413 = vmatpush.msrb.mxu1 %v1981_v23  ;;  %v2045_v38 = vld [vmem:[%s2640_s18 + $0xc40] sm:$0xff]  ;;  %v2082_v2 = vld [vmem:[%s2640_s18 + $0xd68] sm:$0xff] }
 0x134   : > { %1430 = vmatpush.msrb.mxu2 %v2057_v24  ;;  %1450 = vmatpush.msrb.mxu3 %v2121_v25  ;;  %v2109_v39 = vld [vmem:[%s2640_s18 + $0xe40] sm:$0xff]  ;;  %v2146_v3 = vld [vmem:[%s2640_s18 + $0xf68] sm:$0xff] }
 0x135   : > { %1394 = vmatpush.msrb.mxu0 %v1913_v26  ;;  %1414 = vmatpush.msrb.mxu1 %v1977_v27  ;;  %v2041_v42 = vld [vmem:[%s2640_s18 + $0xc20] sm:$0xff]  ;;  %v1938_v4 = vld [vmem:[%s2640_s18 + $0x8e8] sm:$0xff] }
 0x136   : > { %1431 = vmatpush.msrb.mxu2 %v2053_v28  ;;  %1451 = vmatpush.msrb.mxu3 %v2117_v29  ;;  %v2105_v43 = vld [vmem:[%s2640_s18 + $0xe20] sm:$0xff]  ;;  %v2002_v5 = vld [vmem:[%s2640_s18 + $0xae8] sm:$0xff] }
 0x137   : > { %1395 = vmatpush.msrb.mxu0 %v1909_v30  ;;  %1415 = vmatpush.msrb.mxu1 %v1973_v31  ;;  %v2037_v46 = vld [vmem:[%s2640_s18 + $0xc00] sm:$0xff]  ;;  %v2078_v6 = vld [vmem:[%s2640_s18 + $0xd48] sm:$0xff] }
 0x138   : > { %1432 = vmatpush.msrb.mxu2 %v2049_v32  ;;  %1452 = vmatpush.msrb.mxu3 %v2113_v33  ;;  %v2101_v47 = vld [vmem:[%s2640_s18 + $0xe00] sm:$0xff]  ;;  %v2142_v7 = vld [vmem:[%s2640_s18 + $0xf48] sm:$0xff] }
 0x139   : > { %1396 = vmatmul.f32.vlgmr.msrb.gmra.mxu0 %v2778_v20  ;;  %1416 = vmatmul.f32.vlgmr.msrb.gmra.mxu1 %v2780_v21  ;;  %v1934_v8 = vld [vmem:[%s2640_s18 + $0x8c8] sm:$0xff] }
 0x13a   : > { %1460 = vmatpush.msra.mxu0 %v1970_v36  ;;  %1480 = vmatpush.msra.mxu1 %v2034_v37  ;;  %v1998_v9 = vld [vmem:[%s2640_s18 + $0xac8] sm:$0xff] }
 0x13b   : > { %1433 = vmatpush.msrb.mxu2 %v2045_v38  ;;  %1453 = vmatpush.msrb.mxu3 %v2109_v39  ;;  %v2074_v10 = vld [vmem:[%s2640_s18 + $0xd28] sm:$0xff] }
 0x13c   : > { %1461 = vmatpush.msra.mxu0 %v1966_v40  ;;  %1481 = vmatpush.msra.mxu1 %v2030_v41  ;;  %v2138_v11 = vld [vmem:[%s2640_s18 + $0xf28] sm:$0xff]  ;;  %v1971_v40 = vld [vmem:[%s2640_s18 + $0x9f0] sm:$0xff] }
 0x13d   : > { %1434 = vmatpush.msrb.mxu2 %v2041_v42  ;;  %1454 = vmatpush.msrb.mxu3 %v2105_v43  ;;  %v1930_v12 = vld [vmem:[%s2640_s18 + $0x8a8] sm:$0xff]  ;;  %v2035_v41 = vld [vmem:[%s2640_s18 + $0xbf0] sm:$0xff] }
 0x13e   : > { %1462 = vmatpush.msra.mxu0 %v1962_v44  ;;  %1482 = vmatpush.msra.mxu1 %v2026_v45  ;;  %v1994_v13 = vld [vmem:[%s2640_s18 + $0xaa8] sm:$0xff]  ;;  %v1967_v44 = vld [vmem:[%s2640_s18 + $0x9d0] sm:$0xff] }
 0x13f   : > { %1435 = vmatpush.msrb.mxu2 %v2037_v46  ;;  %1455 = vmatpush.msrb.mxu3 %v2101_v47  ;;  %v2070_v14 = vld [vmem:[%s2640_s18 + $0xd08] sm:$0xff]  ;;  %v2031_v45 = vld [vmem:[%s2640_s18 + $0xbd0] sm:$0xff] }
 0x140   : > { %1436 = vmatmul.f32.vlgmr.msrb.gmra.mxu2 %v2790_v34  ;;  %1456 = vmatmul.f32.vlgmr.msrb.gmra.mxu3 %v2792_v35  ;;  %v2134_v15 = vld [vmem:[%s2640_s18 + $0xf08] sm:$0xff] }
 0x141   : > { %1463 = vmatpush.msra.mxu0 %v1958_v48  ;;  %1483 = vmatpush.msra.mxu1 %v2022_v49  ;;  %v1926_v16 = vld [vmem:[%s2640_s18 + $0x888] sm:$0xff]  ;;  %v1963_v48 = vld [vmem:[%s2640_s18 + $0x9b0] sm:$0xff] }
 0x142   : > { %1500 = vmatpush.msra.mxu2 %v2098_v50  ;;  %1520 = vmatpush.msra.mxu3 %v2162_v51  ;;  %v1990_v17 = vld [vmem:[%s2640_s18 + $0xa88] sm:$0xff]  ;;  %v2027_v49 = vld [vmem:[%s2640_s18 + $0xbb0] sm:$0xff] }
 0x143   : > { %1464 = vmatpush.msra.mxu0 %v1954_v52  ;;  %1484 = vmatpush.msra.mxu1 %v2018_v53  ;;  %v2066_v18 = vld [vmem:[%s2640_s18 + $0xce8] sm:$0xff]  ;;  %v1959_v52 = vld [vmem:[%s2640_s18 + $0x990] sm:$0xff] }
 0x144   : > { %1501 = vmatpush.msra.mxu2 %v2094_v54  ;;  %1521 = vmatpush.msra.mxu3 %v2158_v55  ;;  %v2130_v19 = vld [vmem:[%s2640_s18 + $0xee8] sm:$0xff]  ;;  %v2023_v53 = vld [vmem:[%s2640_s18 + $0xb90] sm:$0xff] }
 0x145   : > { %1465 = vmatpush.msra.mxu0 %v1950_v56  ;;  %1485 = vmatpush.msra.mxu1 %v2014_v57  ;;  %v1922_v22 = vld [vmem:[%s2640_s18 + $0x868] sm:$0xff]  ;;  %v2099_v54 = vld [vmem:[%s2640_s18 + $0xdf0] sm:$0xff] }
 0x146   : > { %1502 = vmatpush.msra.mxu2 %v2090_v58  ;;  %1522 = vmatpush.msra.mxu3 %v2154_v59  ;;  %v1986_v23 = vld [vmem:[%s2640_s18 + $0xa68] sm:$0xff]  ;;  %v2163_v55 = vld [vmem:[%s2640_s18 + $0xff0] sm:$0xff] }
 0x147   : > { %1466 = vmatpush.msra.mxu0 %v1946_v60  ;;  %1486 = vmatpush.msra.mxu1 %v2010_v61  ;;  %v2062_v24 = vld [vmem:[%s2640_s18 + $0xcc8] sm:$0xff]  ;;  %v1955_v56 = vld [vmem:[%s2640_s18 + $0x970] sm:$0xff] }
 0x148   : > { %1503 = vmatpush.msra.mxu2 %v2086_v62  ;;  %1523 = vmatpush.msra.mxu3 %v2150_v63  ;;  %v2126_v25 = vld [vmem:[%s2640_s18 + $0xec8] sm:$0xff]  ;;  %v2019_v57 = vld [vmem:[%s2640_s18 + $0xb70] sm:$0xff] }
 0x149   : > { %1467 = vmatpush.msra.mxu0 %v1942_v0  ;;  %1487 = vmatpush.msra.mxu1 %v2006_v1  ;;  %v1918_v26 = vld [vmem:[%s2640_s18 + $0x848] sm:$0xff]  ;;  %v2095_v58 = vld [vmem:[%s2640_s18 + $0xdd0] sm:$0xff] }
 0x14a   : > { %1504 = vmatpush.msra.mxu2 %v2082_v2  ;;  %1524 = vmatpush.msra.mxu3 %v2146_v3  ;;  %v1982_v27 = vld [vmem:[%s2640_s18 + $0xa48] sm:$0xff]  ;;  %v2159_v59 = vld [vmem:[%s2640_s18 + $0xfd0] sm:$0xff] }
 0x14b   : > { %1468 = vmatpush.msra.mxu0 %v1938_v4  ;;  %1488 = vmatpush.msra.mxu1 %v2002_v5  ;;  %v2058_v28 = vld [vmem:[%s2640_s18 + $0xca8] sm:$0xff]  ;;  %v1951_v60 = vld [vmem:[%s2640_s18 + $0x950] sm:$0xff] }
 0x14c   : > { %1505 = vmatpush.msra.mxu2 %v2078_v6  ;;  %1525 = vmatpush.msra.mxu3 %v2142_v7  ;;  %v2122_v29 = vld [vmem:[%s2640_s18 + $0xea8] sm:$0xff]  ;;  %v2015_v61 = vld [vmem:[%s2640_s18 + $0xb50] sm:$0xff] }
 0x14d   : > { %1469 = vmatpush.msra.mxu0 %v1934_v8  ;;  %1489 = vmatpush.msra.mxu1 %v1998_v9  ;;  %v1914_v30 = vld [vmem:[%s2640_s18 + $0x828] sm:$0xff]  ;;  %v2091_v62 = vld [vmem:[%s2640_s18 + $0xdb0] sm:$0xff] }
 0x14e   : > { %1506 = vmatpush.msra.mxu2 %v2074_v10  ;;  %1526 = vmatpush.msra.mxu3 %v2138_v11  ;;  %v1978_v31 = vld [vmem:[%s2640_s18 + $0xa28] sm:$0xff]  ;;  %v2155_v63 = vld [vmem:[%s2640_s18 + $0xfb0] sm:$0xff] }
 0x14f   : > { %1470 = vmatpush.msra.mxu0 %v1930_v12  ;;  %1490 = vmatpush.msra.mxu1 %v1994_v13  ;;  %v2054_v32 = vld [vmem:[%s2640_s18 + $0xc88] sm:$0xff]  ;;  %v1947_v0 = vld [vmem:[%s2640_s18 + $0x930] sm:$0xff] }
 0x150   : > { %1507 = vmatpush.msra.mxu2 %v2070_v14  ;;  %1527 = vmatpush.msra.mxu3 %v2134_v15  ;;  %v2118_v33 = vld [vmem:[%s2640_s18 + $0xe88] sm:$0xff]  ;;  %v2011_v1 = vld [vmem:[%s2640_s18 + $0xb30] sm:$0xff] }
 0x151   : > { %1471 = vmatpush.msra.mxu0 %v1926_v16  ;;  %1491 = vmatpush.msra.mxu1 %v1990_v17  ;;  %v1910_v36 = vld [vmem:[%s2640_s18 + $0x808] sm:$0xff]  ;;  %v2087_v2 = vld [vmem:[%s2640_s18 + $0xd90] sm:$0xff] }
 0x152   : > { %1508 = vmatpush.msra.mxu2 %v2066_v18  ;;  %1528 = vmatpush.msra.mxu3 %v2130_v19  ;;  %v1974_v37 = vld [vmem:[%s2640_s18 + $0xa08] sm:$0xff]  ;;  %v2151_v3 = vld [vmem:[%s2640_s18 + $0xf90] sm:$0xff] }
 0x153   : > { %1472 = vmatpush.msra.mxu0 %v1922_v22  ;;  %1492 = vmatpush.msra.mxu1 %v1986_v23  ;;  %v2050_v38 = vld [vmem:[%s2640_s18 + $0xc68] sm:$0xff]  ;;  %v1943_v4 = vld [vmem:[%s2640_s18 + $0x910] sm:$0xff] }
 0x154   : > { %1509 = vmatpush.msra.mxu2 %v2062_v24  ;;  %1529 = vmatpush.msra.mxu3 %v2126_v25  ;;  %v2114_v39 = vld [vmem:[%s2640_s18 + $0xe68] sm:$0xff]  ;;  %v2007_v5 = vld [vmem:[%s2640_s18 + $0xb10] sm:$0xff] }
 0x155   : > { %1473 = vmatpush.msra.mxu0 %v1918_v26  ;;  %1493 = vmatpush.msra.mxu1 %v1982_v27  ;;  %v2046_v42 = vld [vmem:[%s2640_s18 + $0xc48] sm:$0xff]  ;;  %v2083_v6 = vld [vmem:[%s2640_s18 + $0xd70] sm:$0xff] }
 0x156   : > { %1510 = vmatpush.msra.mxu2 %v2058_v28  ;;  %1530 = vmatpush.msra.mxu3 %v2122_v29  ;;  %v2110_v43 = vld [vmem:[%s2640_s18 + $0xe48] sm:$0xff]  ;;  %v2147_v7 = vld [vmem:[%s2640_s18 + $0xf70] sm:$0xff] }
 0x157   : > { %1474 = vmatpush.msra.mxu0 %v1914_v30  ;;  %1494 = vmatpush.msra.mxu1 %v1978_v31  ;;  %v2042_v46 = vld [vmem:[%s2640_s18 + $0xc28] sm:$0xff]  ;;  %v1939_v8 = vld [vmem:[%s2640_s18 + $0x8f0] sm:$0xff] }
 0x158   : > { %1511 = vmatpush.msra.mxu2 %v2054_v32  ;;  %1531 = vmatpush.msra.mxu3 %v2118_v33  ;;  %v2106_v47 = vld [vmem:[%s2640_s18 + $0xe28] sm:$0xff]  ;;  %v2003_v9 = vld [vmem:[%s2640_s18 + $0xaf0] sm:$0xff] }
 0x159   : > { %1475 = vmatpush.msra.mxu0 %v1910_v36  ;;  %1495 = vmatpush.msra.mxu1 %v1974_v37  ;;  %v2038_v50 = vld [vmem:[%s2640_s18 + $0xc08] sm:$0xff]  ;;  %v2079_v10 = vld [vmem:[%s2640_s18 + $0xd50] sm:$0xff] }
 0x15a   : > { %1512 = vmatpush.msra.mxu2 %v2050_v38  ;;  %1532 = vmatpush.msra.mxu3 %v2114_v39  ;;  %v2102_v51 = vld [vmem:[%s2640_s18 + $0xe08] sm:$0xff]  ;;  %v2143_v11 = vld [vmem:[%s2640_s18 + $0xf50] sm:$0xff] }
 0x15b   : > { %1476 = vmatmul.f32.vlgmr.msra.gmra.mxu0 %v2778_v20  ;;  %1496 = vmatmul.f32.vlgmr.msra.gmra.mxu1 %v2780_v21  ;;  %v1935_v12 = vld [vmem:[%s2640_s18 + $0x8d0] sm:$0xff] }
 0x15c   : > { %1540 = vmatpush.msrb.mxu0 %v1971_v40  ;;  %1560 = vmatpush.msrb.mxu1 %v2035_v41  ;;  %v1999_v13 = vld [vmem:[%s2640_s18 + $0xad0] sm:$0xff] }
 0x15d   : > { %1513 = vmatpush.msra.mxu2 %v2046_v42  ;;  %1533 = vmatpush.msra.mxu3 %v2110_v43  ;;  %v2075_v14 = vld [vmem:[%s2640_s18 + $0xd30] sm:$0xff] }
 0x15e   : > { %1541 = vmatpush.msrb.mxu0 %v1967_v44  ;;  %1561 = vmatpush.msrb.mxu1 %v2031_v45  ;;  %v2139_v15 = vld [vmem:[%s2640_s18 + $0xf30] sm:$0xff]  ;;  %v1972_v44 = vld [vmem:[%s2640_s18 + $0x9f8] sm:$0xff] }
 0x15f   : > { %1514 = vmatpush.msra.mxu2 %v2042_v46  ;;  %1534 = vmatpush.msra.mxu3 %v2106_v47  ;;  %v1931_v16 = vld [vmem:[%s2640_s18 + $0x8b0] sm:$0xff]  ;;  %v2036_v45 = vld [vmem:[%s2640_s18 + $0xbf8] sm:$0xff] }
 0x160   : > { %1542 = vmatpush.msrb.mxu0 %v1963_v48  ;;  %1562 = vmatpush.msrb.mxu1 %v2027_v49  ;;  %v1995_v17 = vld [vmem:[%s2640_s18 + $0xab0] sm:$0xff]  ;;  %v1968_v48 = vld [vmem:[%s2640_s18 + $0x9d8] sm:$0xff] }
 0x161   : > { %1515 = vmatpush.msra.mxu2 %v2038_v50  ;;  %1535 = vmatpush.msra.mxu3 %v2102_v51  ;;  %v2071_v18 = vld [vmem:[%s2640_s18 + $0xd10] sm:$0xff]  ;;  %v2032_v49 = vld [vmem:[%s2640_s18 + $0xbd8] sm:$0xff] }
 0x162   : > { %1516 = vmatmul.f32.vlgmr.msra.gmra.mxu2 %v2790_v34  ;;  %1536 = vmatmul.f32.vlgmr.msra.gmra.mxu3 %v2792_v35  ;;  %v2135_v19 = vld [vmem:[%s2640_s18 + $0xf10] sm:$0xff] }
 0x163   : > { %1543 = vmatpush.msrb.mxu0 %v1959_v52  ;;  %1563 = vmatpush.msrb.mxu1 %v2023_v53  ;;  %v1927_v22 = vld [vmem:[%s2640_s18 + $0x890] sm:$0xff]  ;;  %v3134_v52 = vpop.f32.mrf.mxu0  ;;  %v1964_v53 = vld [vmem:[%s2640_s18 + $0x9b8] sm:$0xff] }
 0x164   : > { %1580 = vmatpush.msrb.mxu2 %v2099_v54  ;;  %1600 = vmatpush.msrb.mxu3 %v2163_v55  ;;  %v1991_v23 = vld [vmem:[%s2640_s18 + $0xa90] sm:$0xff]  ;;  %v2028_v54 = vld [vmem:[%s2640_s18 + $0xbb8] sm:$0xff] }
 0x165   : > { %1544 = vmatpush.msrb.mxu0 %v1955_v56  ;;  %1564 = vmatpush.msrb.mxu1 %v2019_v57  ;;  %v2067_v24 = vld [vmem:[%s2640_s18 + $0xcf0] sm:$0xff]  ;;  %v1960_v57 = vld [vmem:[%s2640_s18 + $0x998] sm:$0xff] }
 0x166   : > { %1581 = vmatpush.msrb.mxu2 %v2095_v58  ;;  %1601 = vmatpush.msrb.mxu3 %v2159_v59  ;;  %v2131_v25 = vld [vmem:[%s2640_s18 + $0xef0] sm:$0xff]  ;;  %v2024_v58 = vld [vmem:[%s2640_s18 + $0xb98] sm:$0xff] }
 0x167   : > { %1545 = vmatpush.msrb.mxu0 %v1951_v60  ;;  %1565 = vmatpush.msrb.mxu1 %v2015_v61  ;;  %v1923_v26 = vld [vmem:[%s2640_s18 + $0x870] sm:$0xff]  ;;  %v2100_v59 = vld [vmem:[%s2640_s18 + $0xdf8] sm:$0xff] }
 0x168   : > { %1582 = vmatpush.msrb.mxu2 %v2091_v62  ;;  %1602 = vmatpush.msrb.mxu3 %v2155_v63  ;;  %v1987_v27 = vld [vmem:[%s2640_s18 + $0xa70] sm:$0xff]  ;;  %v2164_v60 = vld [vmem:[%s2640_s18 + $0xff8] sm:$0xff]  ;;  %v3148_v63 = vpop.f32.mrf.mxu1 }
 0x169   : > { %1546 = vmatpush.msrb.mxu0 %v1947_v0  ;;  %1566 = vmatpush.msrb.mxu1 %v2011_v1  ;;  %v2063_v28 = vld [vmem:[%s2640_s18 + $0xcd0] sm:$0xff]  ;;  %v1956_v61 = vld [vmem:[%s2640_s18 + $0x978] sm:$0xff] }
 0x16a   : > { %1583 = vmatpush.msrb.mxu2 %v2087_v2  ;;  %1603 = vmatpush.msrb.mxu3 %v2151_v3  ;;  %v2127_v29 = vld [vmem:[%s2640_s18 + $0xed0] sm:$0xff]  ;;  %v2020_v62 = vld [vmem:[%s2640_s18 + $0xb78] sm:$0xff] }
 0x16b   : > { %1547 = vmatpush.msrb.mxu0 %v1943_v4  ;;  %1567 = vmatpush.msrb.mxu1 %v2007_v5  ;;  %v1919_v30 = vld [vmem:[%s2640_s18 + $0x850] sm:$0xff]  ;;  %v2096_v0 = vld [vmem:[%s2640_s18 + $0xdd8] sm:$0xff]  ;;  %v3154_v4 = vpop.f32.mrf.mxu2 }
 0x16c   : > { %1584 = vmatpush.msrb.mxu2 %v2083_v6  ;;  %1604 = vmatpush.msrb.mxu3 %v2147_v7  ;;  %v1983_v31 = vld [vmem:[%s2640_s18 + $0xa50] sm:$0xff]  ;;  %v2160_v1 = vld [vmem:[%s2640_s18 + $0xfd8] sm:$0xff] }
 0x16d   : > { %1548 = vmatpush.msrb.mxu0 %v1939_v8  ;;  %1568 = vmatpush.msrb.mxu1 %v2003_v9  ;;  %v2059_v32 = vld [vmem:[%s2640_s18 + $0xcb0] sm:$0xff]  ;;  %v1952_v2 = vld [vmem:[%s2640_s18 + $0x958] sm:$0xff]  ;;  %v3164_v9 = vpop.f32.mrf.mxu0 }
 0x16e   : > { %1585 = vmatpush.msrb.mxu2 %v2079_v10  ;;  %1605 = vmatpush.msrb.mxu3 %v2143_v11  ;;  %v2123_v33 = vld [vmem:[%s2640_s18 + $0xeb0] sm:$0xff]  ;;  %v2016_v3 = vld [vmem:[%s2640_s18 + $0xb58] sm:$0xff]  ;;  %v3166_v10 = vpop.f32.mrf.mxu3 }
 0x16f   : > { %1549 = vmatpush.msrb.mxu0 %v1935_v12  ;;  %1569 = vmatpush.msrb.mxu1 %v1999_v13  ;;  %v1915_v36 = vld [vmem:[%s2640_s18 + $0x830] sm:$0xff]  ;;  %v2092_v5 = vld [vmem:[%s2640_s18 + $0xdb8] sm:$0xff] }
 0x170   : > { %1586 = vmatpush.msrb.mxu2 %v2075_v14  ;;  %1606 = vmatpush.msrb.mxu3 %v2139_v15  ;;  %v1979_v37 = vld [vmem:[%s2640_s18 + $0xa30] sm:$0xff]  ;;  %v2156_v6 = vld [vmem:[%s2640_s18 + $0xfb8] sm:$0xff] }
 0x171   : > { %1550 = vmatpush.msrb.mxu0 %v1931_v16  ;;  %1570 = vmatpush.msrb.mxu1 %v1995_v17  ;;  %v2055_v38 = vld [vmem:[%s2640_s18 + $0xc90] sm:$0xff]  ;;  %v1948_v7 = vld [vmem:[%s2640_s18 + $0x938] sm:$0xff] }
 0x172   : > { %1587 = vmatpush.msrb.mxu2 %v2071_v18  ;;  %1607 = vmatpush.msrb.mxu3 %v2135_v19  ;;  %v2119_v39 = vld [vmem:[%s2640_s18 + $0xe90] sm:$0xff]  ;;  %v2012_v8 = vld [vmem:[%s2640_s18 + $0xb38] sm:$0xff] }
 0x173   : > { %1551 = vmatpush.msrb.mxu0 %v1927_v22  ;;  %1571 = vmatpush.msrb.mxu1 %v1991_v23  ;;  %v1911_v40 = vld [vmem:[%s2640_s18 + $0x810] sm:$0xff]  ;;  %v2088_v11 = vld [vmem:[%s2640_s18 + $0xd98] sm:$0xff] }
 0x174   : > { %1588 = vmatpush.msrb.mxu2 %v2067_v24  ;;  %1608 = vmatpush.msrb.mxu3 %v2131_v25  ;;  %v1975_v41 = vld [vmem:[%s2640_s18 + $0xa10] sm:$0xff]  ;;  %v2152_v12 = vld [vmem:[%s2640_s18 + $0xf98] sm:$0xff]  ;;  %v3183_v25 = vld [vmem:[%s295_s14] sm:$0xf] }
 0x175   : > { %1552 = vmatpush.msrb.mxu0 %v1923_v26  ;;  %1572 = vmatpush.msrb.mxu1 %v1987_v27  ;;  %v2051_v42 = vld [vmem:[%s2640_s18 + $0xc70] sm:$0xff]  ;;  %v1944_v13 = vld [vmem:[%s2640_s18 + $0x918] sm:$0xff]  ;;  %v843_v26 = vpop.f32.mrf.mxu1 }
 0x176   : > { %1589 = vmatpush.msrb.mxu2 %v2063_v28  ;;  %1609 = vmatpush.msrb.mxu3 %v2127_v29  ;;  %v2115_v43 = vld [vmem:[%s2640_s18 + $0xe70] sm:$0xff]  ;;  %v2008_v14 = vld [vmem:[%s2640_s18 + $0xb18] sm:$0xff] }
 0x177   : > { %1553 = vmatpush.msrb.mxu0 %v1919_v30  ;;  %1573 = vmatpush.msrb.mxu1 %v1983_v31  ;;  %v2047_v46 = vld [vmem:[%s2640_s18 + $0xc50] sm:$0xff]  ;;  %v2084_v15 = vld [vmem:[%s2640_s18 + $0xd78] sm:$0xff]  ;;  %v863_v31 = vpop.f32.mrf.mxu2 }
 0x178   : > { %1590 = vmatpush.msrb.mxu2 %v2059_v32  ;;  %1610 = vmatpush.msrb.mxu3 %v2123_v33  ;;  %v2111_v47 = vld [vmem:[%s2640_s18 + $0xe50] sm:$0xff]  ;;  %v2148_v16 = vld [vmem:[%s2640_s18 + $0xf78] sm:$0xff]  ;;  %v903_v32 = vpop.f32.mrf.mxu0 }
 0x179   : > { %1554 = vmatpush.msrb.mxu0 %v1915_v36  ;;  %1574 = vmatpush.msrb.mxu1 %v1979_v37  ;;  %v2043_v50 = vld [vmem:[%s2640_s18 + $0xc30] sm:$0xff]  ;;  %v1940_v17 = vld [vmem:[%s2640_s18 + $0x8f8] sm:$0xff]  ;;  %v718_v37 = vperm.slane %v3183_v25, 0 }
 0x17a   : > { %1591 = vmatpush.msrb.mxu2 %v2055_v38  ;;  %1611 = vmatpush.msrb.mxu3 %v2119_v39  ;;  %v2107_v51 = vld [vmem:[%s2640_s18 + $0xe30] sm:$0xff]  ;;  %v2004_v18 = vld [vmem:[%s2640_s18 + $0xaf8] sm:$0xff]  ;;  %v719_v38 = vperm.slane %v3183_v25, 1 }
 0x17b   : > { %1555 = vmatpush.msrb.mxu0 %v1911_v40  ;;  %1575 = vmatpush.msrb.mxu1 %v1975_v41  ;;  %v2039_v55 = vld [vmem:[%s2640_s18 + $0xc10] sm:$0xff]  ;;  %v2080_v19 = vld [vmem:[%s2640_s18 + $0xd58] sm:$0xff]  ;;  %v3195_v41 = vpop.f32.mrf.mxu3 }
 0x17c   : > { %1592 = vmatpush.msrb.mxu2 %v2051_v42  ;;  %1612 = vmatpush.msrb.mxu3 %v2115_v43  ;;  %v2103_v56 = vld [vmem:[%s2640_s18 + $0xe10] sm:$0xff]  ;;  %v2144_v22 = vld [vmem:[%s2640_s18 + $0xf58] sm:$0xff] }
 0x17d   : > { %1556 = vmatmul.f32.vlgmr.msrb.gmra.mxu0 %v2778_v20  ;;  %1576 = vmatmul.f32.vlgmr.msrb.gmra.mxu1 %v2780_v21  ;;  %v1936_v23 = vld [vmem:[%s2640_s18 + $0x8d8] sm:$0xff] }
 0x17e   : > { %1620 = vmatpush.msra.mxu0 %v1972_v44  ;;  %1640 = vmatpush.msra.mxu1 %v2036_v45  ;;  %v2000_v24 = vld [vmem:[%s2640_s18 + $0xad8] sm:$0xff]  ;;  %v720_v44 = vperm.slane %v3183_v25, 2 }
 0x17f   : > { %1593 = vmatpush.msrb.mxu2 %v2047_v46  ;;  %1613 = vmatpush.msrb.mxu3 %v2111_v47  ;;  %v2076_v27 = vld [vmem:[%s2640_s18 + $0xd38] sm:$0xff] }
 0x180   : > { %1621 = vmatpush.msra.mxu0 %v1968_v48  ;;  %1641 = vmatpush.msra.mxu1 %v2032_v49  ;;  %v2140_v28 = vld [vmem:[%s2640_s18 + $0xf38] sm:$0xff]  ;;  %v744_v49 = vadd.f32 %v3134_v52, %v718_v37 }
 0x181   : > { %1594 = vmatpush.msrb.mxu2 %v2043_v50  ;;  %1614 = vmatpush.msrb.mxu3 %v2107_v51  ;;  %v1932_v29 = vld [vmem:[%s2640_s18 + $0x8b8] sm:$0xff]  ;;  %v824_v50 = vadd.f32 %v3164_v9, %v719_v38 }
 0x182   : > { %1622 = vmatpush.msra.mxu0 %v1964_v53  ;;  %1642 = vmatpush.msra.mxu1 %v2028_v54  ;;  %v1996_v30 = vld [vmem:[%s2640_s18 + $0xab8] sm:$0xff]  ;;  %v923_v54 = vpop.f32.mrf.mxu1 }
 0x183   : > { %1595 = vmatpush.msrb.mxu2 %v2039_v55  ;;  %1615 = vmatpush.msrb.mxu3 %v2103_v56  ;;  %v2072_v33 = vld [vmem:[%s2640_s18 + $0xd18] sm:$0xff] }
 0x184   : > { %1596 = vmatmul.f32.vlgmr.msrb.gmra.mxu2 %v2790_v34  ;;  %1616 = vmatmul.f32.vlgmr.msrb.gmra.mxu3 %v2792_v35  ;;  %v2136_v36 = vld [vmem:[%s2640_s18 + $0xf18] sm:$0xff] }
 0x185   : > { %1623 = vmatpush.msra.mxu0 %v1960_v57  ;;  %1643 = vmatpush.msra.mxu1 %v2024_v58  ;;  %v1928_v39 = vld [vmem:[%s2640_s18 + $0x898] sm:$0xff]  ;;  %v904_v57 = vadd.f32 %v903_v32, %v720_v44 }
 0x186   : > { %1660 = vmatpush.msra.mxu2 %v2100_v59  ;;  %1680 = vmatpush.msra.mxu3 %v2164_v60  ;;  %v1992_v40 = vld [vmem:[%s2640_s18 + $0xa98] sm:$0xff]  ;;  %v721_v59 = vperm.slane %v3183_v25, 3  ;;  %v943_v60 = vpop.f32.mrf.mxu2 }
 0x187   : > { %1624 = vmatpush.msra.mxu0 %v1956_v61  ;;  %1644 = vmatpush.msra.mxu1 %v2020_v62  ;;  %v2068_v42 = vld [vmem:[%s2640_s18 + $0xcf8] sm:$0xff] }
 0x188   : > { %1661 = vmatpush.msra.mxu2 %v2096_v0  ;;  %1681 = vmatpush.msra.mxu3 %v2160_v1  ;;  %v2132_v43 = vld [vmem:[%s2640_s18 + $0xef8] sm:$0xff]  ;;  %v764_v1 = vadd.f32 %v3148_v63, %v744_v49 }
 0x189   : > { %1625 = vmatpush.msra.mxu0 %v1952_v2  ;;  %1645 = vmatpush.msra.mxu1 %v2016_v3  ;;  %v1924_v45 = vld [vmem:[%s2640_s18 + $0x878] sm:$0xff]  ;;  %v844_v2 = vadd.f32 %v843_v26, %v824_v50 }
 0x18a   : > { %1662 = vmatpush.msra.mxu2 %v2092_v5  ;;  %1682 = vmatpush.msra.mxu3 %v2156_v6  ;;  %v1988_v46 = vld [vmem:[%s2640_s18 + $0xa78] sm:$0xff]  ;;  %v963_v6 = vpop.f32.mrf.mxu3 }
 0x18b   : > { %1626 = vmatpush.msra.mxu0 %v1948_v7  ;;  %1646 = vmatpush.msra.mxu1 %v2012_v8  ;;  %v2064_v47 = vld [vmem:[%s2640_s18 + $0xcd8] sm:$0xff]  ;;  %v864_v9 = vadd.f32 %v863_v31, %v844_v2 }
 0x18c   : > { %1663 = vmatpush.msra.mxu2 %v2088_v11  ;;  %1683 = vmatpush.msra.mxu3 %v2152_v12  ;;  %v2128_v48 = vld [vmem:[%s2640_s18 + $0xed8] sm:$0xff]  ;;  %v924_v11 = vadd.f32 %v923_v54, %v904_v57 }
 0x18d   : > { %1627 = vmatpush.msra.mxu0 %v1944_v13  ;;  %1647 = vmatpush.msra.mxu1 %v2008_v14  ;;  %v1920_v51 = vld [vmem:[%s2640_s18 + $0x858] sm:$0xff]  ;;  %v784_v14 = vadd.f32 %v3154_v4, %v764_v1 }
 0x18e   : > { %1664 = vmatpush.msra.mxu2 %v2084_v15  ;;  %1684 = vmatpush.msra.mxu3 %v2148_v16  ;;  %v1984_v53 = vld [vmem:[%s2640_s18 + $0xa58] sm:$0xff]  ;;  %v944_v15 = vadd.f32 %v943_v60, %v924_v11 }
 0x18f   : > { %1628 = vmatpush.msra.mxu0 %v1940_v17  ;;  %1648 = vmatpush.msra.mxu1 %v2004_v18  ;;  %v2060_v55 = vld [vmem:[%s2640_s18 + $0xcb8] sm:$0xff]  ;;  %v804_v4 = vadd.f32 %v3166_v10, %v784_v14 }
 0x190   : > { %1665 = vmatpush.msra.mxu2 %v2080_v19  ;;  %1685 = vmatpush.msra.mxu3 %v2144_v22  ;;  %v2124_v56 = vld [vmem:[%s2640_s18 + $0xeb8] sm:$0xff]  ;;  %v884_v19 = vadd.f32 %v3195_v41, %v864_v9  ;;  %v964_v26 = vadd.f32 %v963_v6, %v944_v15 }
 0x191   : > { %1629 = vmatpush.msra.mxu0 %v1936_v23  ;;  %1649 = vmatpush.msra.mxu1 %v2000_v24  ;;  %v1916_v58 = vld [vmem:[%s2640_s18 + $0x838] sm:$0xff] }
 0x192   : > { %1666 = vmatpush.msra.mxu2 %v2076_v27  ;;  %1686 = vmatpush.msra.mxu3 %v2140_v28  ;;  %v1980_v52 = vld [vmem:[%s2640_s18 + $0xa38] sm:$0xff]  ;;  %v1049_v10 = vsel %vm1046_vm2, %v964_v26, -inf }
 0x193   : > { %1630 = vmatpush.msra.mxu0 %v1932_v29  ;;  %1650 = vmatpush.msra.mxu1 %v1996_v30  ;;  %v2056_v61 = vld [vmem:[%s2640_s18 + $0xc98] sm:$0xff]  ;;  %v1047_v29 = vsel %vm1046_vm2, %v804_v4, -inf }
 0x194   : > { %1667 = vmatpush.msra.mxu2 %v2072_v33  ;;  %1687 = vmatpush.msra.mxu3 %v2136_v36  ;;  %v2120_v62 = vld [vmem:[%s2640_s18 + $0xe98] sm:$0xff]  ;;  %v983_v0 = vpop.f32.mrf.mxu0  ;;  %v1003_v16 = vpop.f32.mrf.mxu1 }
 0x195   : > { %1631 = vmatpush.msra.mxu0 %v1928_v39  ;;  %1651 = vmatpush.msra.mxu1 %v1992_v40  ;;  %v1912_v3 = vld [vmem:[%s2640_s18 + $0x818] sm:$0xff]  ;;  %v984_v12 = vadd.f32 %v983_v0, %v721_v59 }
 0x196   : > { %1668 = vmatpush.msra.mxu2 %v2068_v42  ;;  %1688 = vmatpush.msra.mxu3 %v2132_v43  ;;  %v1976_v5 = vld [vmem:[%s2640_s18 + $0xa18] sm:$0xff] }
 0x197   : > { %1632 = vmatpush.msra.mxu0 %v1924_v45  ;;  %1652 = vmatpush.msra.mxu1 %v1988_v46  ;;  %v2052_v7 = vld [vmem:[%s2640_s18 + $0xc78] sm:$0xff]  ;;  %v1004_v22 = vadd.f32 %v1003_v16, %v984_v12 }
 0x198   : > { %1669 = vmatpush.msra.mxu2 %v2064_v47  ;;  %1689 = vmatpush.msra.mxu3 %v2128_v48  ;;  %v2116_v8 = vld [vmem:[%s2640_s18 + $0xe78] sm:$0xff] }
 0x199   : > { %1633 = vmatpush.msra.mxu0 %v1920_v51  ;;  %1653 = vmatpush.msra.mxu1 %v1984_v53  ;;  %v2048_v63 = vld [vmem:[%s2640_s18 + $0xc58] sm:$0xff] }
 0x19a   : > { %1670 = vmatpush.msra.mxu2 %v2060_v55  ;;  %1690 = vmatpush.msra.mxu3 %v2124_v56  ;;  %v2112_v13 = vld [vmem:[%s2640_s18 + $0xe58] sm:$0xff] }
 0x19b   : > { %1634 = vmatpush.msra.mxu0 %v1916_v58  ;;  %1654 = vmatpush.msra.mxu1 %v1980_v52  ;;  %v2044_v17 = vld [vmem:[%s2640_s18 + $0xc38] sm:$0xff] }
 0x19c   : > { %1671 = vmatpush.msra.mxu2 %v2056_v61  ;;  %1691 = vmatpush.msra.mxu3 %v2120_v62  ;;  %v2108_v18 = vld [vmem:[%s2640_s18 + $0xe38] sm:$0xff] }
 0x19d   : > { %1635 = vmatpush.msra.mxu0 %v1912_v3  ;;  %1655 = vmatpush.msra.mxu1 %v1976_v5  ;;  %v2040_v23 = vld [vmem:[%s2640_s18 + $0xc18] sm:$0xff] }
 0x19e   : > { %1672 = vmatpush.msra.mxu2 %v2052_v7  ;;  %1692 = vmatpush.msra.mxu3 %v2116_v8  ;;  %v2104_v24 = vld [vmem:[%s2640_s18 + $0xe18] sm:$0xff] }
 0x19f   : > { %1636 = vmatmul.f32.vlgmr.msra.gmra.mxu0 %v2778_v20  ;;  %1656 = vmatmul.f32.vlgmr.msra.gmra.mxu1 %v2780_v21  ;;  %v1048_v21 = vsel %vm1046_vm2, %v884_v19, -inf }
 0x1a0   : > { %1673 = vmatpush.msra.mxu2 %v2048_v63  ;;  %1693 = vmatpush.msra.mxu3 %v2112_v13  ;;  %v1051_v31 = vmax.f32 %v1047_v29, %v1048_v21 }
 0x1a1   : > { %v1023_v25 = vpop.f32.mrf.mxu2  ;;  %v1043_v20 = vpop.f32.mrf.mxu3 }
 0x1a2   : > { %1674 = vmatpush.msra.mxu2 %v2044_v17  ;;  %1694 = vmatpush.msra.mxu3 %v2108_v18  ;;  %v1024_v27 = vadd.f32 %v1023_v25, %v1004_v22 }
 0x1a4   : > { %1675 = vmatpush.msra.mxu2 %v2040_v23  ;;  %1695 = vmatpush.msra.mxu3 %v2104_v24  ;;  %v1044_v28 = vadd.f32 %v1043_v20, %v1024_v27 }
 0x1a5   : > { %1676 = vmatmul.f32.vlgmr.msra.gmra.mxu2 %v2790_v34  ;;  %1696 = vmatmul.f32.vlgmr.msra.gmra.mxu3 %v2792_v35  ;;  %v2165_v34 = vld [vmem:[%s295_s14 + $0x4] sm:$0xf] }
 0x1a6   : > { %v1050_v30 = vsel %vm1046_vm2, %v1044_v28, -inf  ;;  %v1373_v43 = vperm.slane %v2165_v34, 1  ;;  %v1372_v44 = vperm.slane %v2165_v34, 0  ;;  %v1374_v46 = vperm.slane %v2165_v34, 2 }
 0x1a7   : > { %v1052_v32 = vmax.f32 %v1049_v10, %v1050_v30  ;;  %v1375_v50 = vperm.slane %v2165_v34, 3 }
 0x1a9   : > { %v1053_v33 = vmax.f32 %v1051_v31, %v1052_v32 }
 0x1ab   : > { %1054 = vmax.xlane.f32.xlu0 %v1053_v33 }
 0x1b6   : > { %v1397_v36 = vpop.f32.mrf.mxu0  ;;  %v1417_v37 = vpop.f32.mrf.mxu1 }
 0x1b7   : > { %v1398_v48 = vadd.f32 %v1397_v36, %v1372_v44 }
 0x1b9   : > { %v1418_v0 = vadd.f32 %v1417_v37, %v1398_v48 }
 0x1c3   : > { %v1437_v38 = vpop.f32.mrf.mxu2  ;;  %v1457_v40 = vpop.f32.mrf.mxu3 }
 0x1c4   : > { %v1438_v7 = vadd.f32 %v1437_v38, %v1418_v0 }
 0x1c6   : > { %v1458_v14 = vadd.f32 %v1457_v40, %v1438_v7 }
 0x1c8   : > { %v1700_v27 = vsel %vm1046_vm2, %v1458_v14, -inf }
 0x1d8   : > { %v1477_v39 = vpop.f32.mrf.mxu0  ;;  %v1497_v41 = vpop.f32.mrf.mxu1 }
 0x1d9   : > { %v1478_v47 = vadd.f32 %v1477_v39, %v1373_v43 }
 0x1db   : > { %v1498_v59 = vadd.f32 %v1497_v41, %v1478_v47 }
 0x1e5   : > { %v1517_v42 = vpop.f32.mrf.mxu2  ;;  %v1537_v45 = vpop.f32.mrf.mxu3 }
 0x1e6   : > { %v1518_v3 = vadd.f32 %v1517_v42, %v1498_v59 }
 0x1e8   : > { %v1538_v11 = vadd.f32 %v1537_v45, %v1518_v3 }
 0x1ea   : > { %v1701_v23 = vsel %vm1046_vm2, %v1538_v11, -inf }
 0x1eb   : > { %v1704_v29 = vmax.f32 %v1700_v27, %v1701_v23 }
 0x1fa   : > { %v1557_v35 = vpop.f32.mrf.mxu0  ;;  %v1577_v49 = vpop.f32.mrf.mxu1 }
 0x1fb   : > { %v1558_v53 = vadd.f32 %v1557_v35, %v1374_v46 }
 0x1fd   : > { %v1578_v5 = vadd.f32 %v1577_v49, %v1558_v53 }
 0x207   : > { %v1597_v57 = vpop.f32.mrf.mxu2  ;;  %v1617_v1 = vpop.f32.mrf.mxu3 }
 0x208   : > { %v1598_v8 = vadd.f32 %v1597_v57, %v1578_v5 }
 0x20a   : > { %v1618_v15 = vadd.f32 %v1617_v1, %v1598_v8 }
 0x20c   : > { %v1702_v20 = vsel %vm1046_vm2, %v1618_v15, -inf }
 0x21c   : > { %v1637_v58 = vpop.f32.mrf.mxu0  ;;  %v1657_v9 = vpop.f32.mrf.mxu1 }
 0x21d   : > { %v1638_v6 = vadd.f32 %v1637_v58, %v1375_v50 }
 0x21e   : > { %v1055_v51 = vpop.xlane.xlu0 %1054 }
 0x21f   : > { %v1056_v54 = vsub.f32 %v804_v4, %v1055_v51  ;;  %v1057_v55 = vsub.f32 %v884_v19, %v1055_v51  ;;  %v1058_v56 = vsub.f32 %v964_v26, %v1055_v51  ;;  %v1059_v52 = vsub.f32 %v1044_v28, %v1055_v51 }
 0x220   : > { %v1658_v12 = vadd.f32 %v1657_v9, %v1638_v6 }
 0x221   : > { %v1060_v60 = vmul.f32 1.442695, %v1056_v54  ;;  %v1062_v61 = vmul.f32 1.442695, %v1057_v55  ;;  %v1064_v62 = vmul.f32 1.442695, %v1058_v56 }
 0x222   : > { %v1066_v2 = vmul.f32 1.442695, %v1059_v52 }
 0x223   : > { %2251 = vpow2.f32 %v1060_v60 }
 0x224   : > { %2253 = vpow2.f32 %v1062_v61 }
 0x225   : > { %2255 = vpow2.f32 %v1064_v62 }
 0x226   : > { %2257 = vpow2.f32 %v1066_v2  ;;  %v1107_v2 = vlaneseq }
 0x228   : > { %v1677_v63 = vpop.f32.mrf.mxu2  ;;  %v1697_v18 = vpop.f32.mrf.mxu3  ;;  %vm3275_vm8 = vcmp.lt.s32.totalorder %v1107_v2, 512 }
 0x229   : > { %v3239_v13 = vpop.eup %2251  ;;  %v1678_v16 = vadd.f32 %v1677_v63, %v1658_v12 }
 0x22a   : > { %v3241_v17 = vpop.eup %2253  ;;  %v1068_v19 = vsel %vm1046_vm2, %v3239_v13, 0.0 }
 0x22b   : > { %v3245_v22 = vpop.eup %2255  ;;  %v1698_v24 = vadd.f32 %v1697_v18, %v1678_v16  ;;  %v1069_v25 = vsel %vm1046_vm2, %v3241_v17, 0.0 }
 0x22c   : > { %v2258_v4 = vpop.eup %2257  ;;  %v1070_v26 = vadd.f32 %v1069_v25, %v1068_v19  ;;  %v1071_v28 = vsel %vm1046_vm2, %v3245_v22, 0.0 }
 0x22d   : > { %v1703_v21 = vsel %vm1046_vm2, %v1698_v24, -inf  ;;  %v1073_v31 = vsel %vm1046_vm2, %v2258_v4, 0.0 }
 0x22e   : > { %v1705_v10 = vmax.f32 %v1702_v20, %v1703_v21  ;;  %v1072_v30 = vadd.f32 %v1071_v28, %v1070_v26 }
 0x230   : > { %v1706_v32 = vmax.f32 %v1704_v29, %v1705_v10  ;;  %v1074_v33 = vadd.f32 %v1073_v31, %v1072_v30 }
 0x232   : > { %1707 = vmax.xlane.f32.xlu0 %v1706_v32  ;;  %1075 = vadd.xlane.f32.xlu1 %v1074_v33 }
 0x2a5   : > { %v1708_v36 = vpop.xlane.xlu0 %1707  ;;  %v1076_v37 = vpop.xlane.xlu1 %1075 }
 0x2a6   : > { %v1709_v38 = vsub.f32 %v1458_v14, %v1708_v36  ;;  %v1710_v39 = vsub.f32 %v1538_v11, %v1708_v36  ;;  %v1711_v40 = vsub.f32 %v1618_v15, %v1708_v36  ;;  %v1712_v41 = vsub.f32 %v1698_v24, %v1708_v36 }
 0x2a7   : > { %2259 = vrcp.f32 %v1076_v37  ;;  %v1088_v49 = vand.u32 2147483648, %v1076_v37  ;;  %v1086_v54 = vand.u32 2147483647, %v1076_v37  ;;  %vm1082_vm4 = vweird.f32 %v1076_v37 }
 0x2a8   : > { %v1713_v34 = vmul.f32 1.442695, %v1709_v38  ;;  %v1715_v42 = vmul.f32 1.442695, %v1710_v39  ;;  %v1717_v35 = vmul.f32 1.442695, %v1711_v40 }
 0x2a9   : > { %v1719_v43 = vmul.f32 1.442695, %v1712_v41  ;;  %v1089_v59 = vor.u32 1.1754944e-38, %v1088_v49  ;;  %vm1087_vm6 = vcmp.eq.f32.partialorder %v1086_v54, 8.507059e+37 }
 0x2aa   : > { %2261 = vpow2.f32 %v1713_v34 }
 0x2ab   : > { %2263 = vpow2.f32 %v1715_v42 }
 0x2ac   : > { %2265 = vpow2.f32 %v1717_v35 }
 0x2ad   : > { %v2260_v44 = vpop.eup %2259  ;;  %2267 = vpow2.f32 %v1719_v43 }
 0x2ae   : > { %v1078_v45 = vmul.f32 %v2260_v44, %v1076_v37  ;;  %vm1083_vm3 = vweird.f32 %v2260_v44 }
 0x2af   : > { %vm1084_vm5 = vmor %vm1082_vm4, %vm1083_vm3 }
 0x2b0   : > { %v2262_v46 = vpop.eup %2261  ;;  %v1079_v47 = vsub.f32 1.0, %v1078_v45 }
 0x2b1   : > { %v2264_v48 = vpop.eup %2263  ;;  %v1721_v50 = vsel %vm1046_vm2, %v2262_v46, 0.0 }
 0x2b2   : > { %v2266_v51 = vpop.eup %2265  ;;  %v1080_v53 = vmul.f32 %v2260_v44, %v1079_v47  ;;  %v1722_v55 = vsel %vm1046_vm2, %v2264_v48, 0.0 }
 0x2b3   : > { %v2268_v56 = vpop.eup %2267  ;;  %v1723_v57 = vadd.f32 %v1722_v55, %v1721_v50  ;;  %v1724_v52 = vsel %vm1046_vm2, %v2266_v51, 0.0 }
 0x2b4   : > { %v1081_v58 = vadd.f32 %v2260_v44, %v1080_v53  ;;  %v1726_v62 = vsel %vm1046_vm2, %v2268_v56, 0.0 }
 0x2b5   : > { %v1725_v60 = vadd.f32 %v1724_v52, %v1723_v57 }
 0x2b6   : > { %v1085_v61 = vsel %vm1084_vm5, %v2260_v44, %v1081_v58 }
 0x2b7   : > { %v1090_v0 = vsel %vm1087_vm6, %v1089_v59, %v1085_v61  ;;  %v1727_v1 = vadd.f32 %v1726_v62, %v1725_v60 }
 0x2b8   : > { %v1092_v3 = vmul.f32 %v3241_v17, %v1090_v0  ;;  %v1093_v5 = vmul.f32 %v3245_v22, %v1090_v0  ;;  %v1094_v6 = vmul.f32 %v2258_v4, %v1090_v0  ;;  %v1091_v7 = vmul.f32 %v3239_v13, %v1090_v0 }
 0x2b9   : > { %1728 = vadd.xlane.f32.xlu1 %v1727_v1 }
 0x2ba   : > { %v1099_v8 = vrot.slane %v1092_v3, 7  ;;  %v1100_v9 = vrot.slane %v1093_v5, 6  ;;  %v1101_v11 = vrot.slane %v1094_v6, 5 }
 0x2bc   : > { %v1102_v63 = vsel %vm1046_vm2, %v1091_v7, %v1099_v8  ;;  %v1104_v14 = vsel %vm1103_vm7, %v1100_v9, %v1101_v11 }
 0x2bd   : > { %v1105_v15 = vsel %vm363_vm0, %v1102_v63, %v1104_v14 }
 0x2be   : > { %1111 = vst.msk [vmem:[%s3273_s24] sm:$0xf] %vm3275_vm8, %v1105_v15 }
 0x32c   : > { %v1729_v13 = vpop.xlane.xlu1 %1728 }
 0x32d   : > { %2269 = vrcp.f32 %v1729_v13  ;;  %v1741_v19 = vand.u32 2147483648, %v1729_v13  ;;  %v1739_v23 = vand.u32 2147483647, %v1729_v13  ;;  %vm1735_vm10 = vweird.f32 %v1729_v13 }
 0x32f   : > { %v1742_v25 = vor.u32 1.1754944e-38, %v1741_v19  ;;  %vm1740_vm12 = vcmp.eq.f32.partialorder %v1739_v23, 8.507059e+37 }
 0x333   : > { %v2270_v16 = vpop.eup %2269 }
 0x334   : > { %v1731_v17 = vmul.f32 %v2270_v16, %v1729_v13  ;;  %vm1736_vm9 = vweird.f32 %v2270_v16 }
 0x335   : > { %vm1737_vm11 = vmor %vm1735_vm10, %vm1736_vm9 }
 0x336   : > { %v1732_v18 = vsub.f32 1.0, %v1731_v17 }
 0x338   : > { %v1733_v22 = vmul.f32 %v2270_v16, %v1732_v18 }
 0x33a   : > { %v1734_v24 = vadd.f32 %v2270_v16, %v1733_v22 }
 0x33c   : > { %v1738_v4 = vsel %vm1737_vm11, %v2270_v16, %v1734_v24 }
 0x33d   : > { %v1743_v26 = vsel %vm1740_vm12, %v1742_v25, %v1738_v4 }
 0x33e   : > { %v1745_v27 = vmul.f32 %v2264_v48, %v1743_v26  ;;  %v1746_v20 = vmul.f32 %v2266_v51, %v1743_v26  ;;  %v1747_v21 = vmul.f32 %v2268_v56, %v1743_v26  ;;  %v1744_v28 = vmul.f32 %v2262_v46, %v1743_v26 }
 0x340   : > { %v1752_v29 = vrot.slane %v1745_v27, 7  ;;  %v1753_v10 = vrot.slane %v1746_v20, 6  ;;  %v1754_v30 = vrot.slane %v1747_v21, 5 }
 0x342   : > { %v1755_v31 = vsel %vm1046_vm2, %v1744_v28, %v1752_v29  ;;  %v1756_v32 = vsel %vm1103_vm7, %v1753_v10, %v1754_v30 }
 0x343   : > { %v1757_v33 = vsel %vm363_vm0, %v1755_v31, %v1756_v32 }
 0x344   : > { %2166 = vst.msk [vmem:[%s3273_s24 + $0x4] sm:$0xf] %vm3275_vm8, %v1757_v33 }
 0x345 PF: > { %p17_p4 = scmp.ge.s32.totalorder %s2549_s6, 5   ;;  %s3325_s18 = smov %s2455_s19 }
 0x346   : > { %s3326_s19 = smov %s2459_s20  ;;  %s3327_s20 = smov %s2564_s11 }
 0x347   : > { %s3328_s21 = smov %s2549_s6  ;;  %19 = sbr.rel (!%p17_p4) target bundleno = 8 (0x8), region = 107 }
 0x34c   :  { %1783 = vsyncpa [#allocation3], 1 }
 0x34d   :  { %1785 = vsyncpa [#allocation3 + $0x1], 1 }
 0x34e   :  { %1786 = vsyncpa [#allocation5], 1 }
 0x34f   :  { %1787 = vsyncpa [#allocation8], 1 }
 0x350   :  { %1789 = vsyncpa [#allocation8 + $0x1], 1 }

</bundles_post_ra>
